<compile_context>
chip_gen: v7x
topology: tpu7x:2x2x1
jax: 0.10.0
libtpu: 0.0.40
codegen_flags: <defaults>
</compile_context>

<pallas_src>
import functools

import jax
import jax.numpy as jnp
from jax.experimental import pallas as pl
from jax.experimental.pallas import tpu as pltpu


def _round_up(v, m):
    return (v + m - 1) // m * m


def _double_attention_kernel(x_ref, w_ref, b_ref, wr_ref, br_ref, o_ref,
                             glob_ref, globt_ref, mb_ref, lb_ref, mv_ref, lv_ref,
                             *, c_m_p, dn_p, dn, n_true, n_pad):
    p = pl.program_id(1)          # 0 = gathering phase, 1 = distribution phase
    t = pl.program_id(2)          # spatial tile index
    n_tiles = pl.num_programs(2)
    n_tile = x_ref.shape[-1]

    x = x_ref[...]                # (C_p, n_tile) bf16

    # -------- phase 0, first tile: reset the per-batch accumulators --------
    @pl.when(jnp.logical_and(p == 0, t == 0))
    def _init():
        mb_ref[...] = jnp.full(mb_ref.shape, -jnp.inf, dtype=mb_ref.dtype)
        lb_ref[...] = jnp.zeros(lb_ref.shape, dtype=lb_ref.dtype)
        mv_ref[...] = jnp.full(mv_ref.shape, -jnp.inf, dtype=mv_ref.dtype)
        lv_ref[...] = jnp.zeros(lv_ref.shape, dtype=lv_ref.dtype)
        glob_ref[...] = jnp.zeros(glob_ref.shape, dtype=glob_ref.dtype)

    # -------- phase 0: gathering (online softmax over the spatial axis) ----
    @pl.when(p == 0)
    def _gather():
        # Fused 1x1 convs: one MXU matmul for the A / B / V projections.
        proj = jnp.dot(w_ref[...], x, preferred_element_type=jnp.float32)
        proj = proj + b_ref[...]                     # (K_p, n_tile) f32
        a_m = proj[:c_m_p]                           # (c_m_p, n_tile)
        b_m = proj[c_m_p:c_m_p + dn_p]               # (dn_p,  n_tile)
        v_m = proj[c_m_p + dn_p:]                    # (dn_p,  n_tile)

        if n_pad != n_true:                          # mask padded spatial cols
            col = t * n_tile + jax.lax.broadcasted_iota(jnp.int32, (1, n_tile), 1)
            nmask = (col < n_true).astype(jnp.float32)
        else:
            nmask = None

        # online stats for softmax(B) + gathered global descriptors
        mb_new = jnp.maximum(mb_ref[...], jnp.max(b_m, axis=-1, keepdims=True))
        alpha_b = jnp.exp(mb_ref[...] - mb_new)
        e_b = jnp.exp(b_m - mb_new)
        if nmask is not None:
            e_b = e_b * nmask
        lb_ref[...] = alpha_b * lb_ref[...] + jnp.sum(e_b, axis=-1, keepdims=True)
        # contract over the spatial axis of BOTH operands (no transpose).
        part = jax.lax.dot_general(
            e_b.astype(jnp.bfloat16), a_m.astype(jnp.bfloat16),
            dimension_numbers=(((1,), (1,)), ((), ())),
            preferred_element_type=jnp.float32)      # (dn_p, c_m_p)
        glob_ref[...] = alpha_b * glob_ref[...] + part
        mb_ref[...] = mb_new

        # online stats for softmax(V)
        mv_new = jnp.maximum(mv_ref[...], jnp.max(v_m, axis=-1, keepdims=True))
        e_v = jnp.exp(v_m - mv_new)
        if nmask is not None:
            e_v = e_v * nmask
        lv_ref[...] = (jnp.exp(mv_ref[...] - mv_new) * lv_ref[...]
                       + jnp.sum(e_v, axis=-1, keepdims=True))
        mv_ref[...] = mv_new

    # -------- phase 0, last tile: finalize the global descriptors ----------
    @pl.when(jnp.logical_and(p == 0, t == n_tiles - 1))
    def _finalize():
        scale = pl.reciprocal(lb_ref[...] * lv_ref[...], approx=True)  # (dn_p, 1)
        if dn_p != dn:  # padded d-rows must not contribute to the output
            didx = jax.lax.broadcasted_iota(jnp.int32, (dn_p, 1), 0)
            scale = jnp.where(didx < dn, scale, 0.0)
        # one tiny (dn_p, c_m_p) transpose per batch element.
        globt_ref[...] = (glob_ref[...] * scale).T.astype(jnp.bfloat16)

    # -------- phase 1: distribution + 1x1 reconstruct, per spatial tile ----
    @pl.when(p == 1)
    def _distribute():
        w_v = w_ref[pl.ds(c_m_p + dn_p, dn_p), :]    # static, 8-aligned slice
        b_v = b_ref[pl.ds(c_m_p + dn_p, dn_p), :]
        v_m = jnp.dot(w_v, x, preferred_element_type=jnp.float32) + b_v
        e_v = jnp.exp(v_m - mv_ref[...]).astype(jnp.bfloat16)           # (dn_p, n_tile)
        z = jnp.dot(globt_ref[...], e_v, preferred_element_type=jnp.float32)  # (c_m_p, n_tile)
        out = jnp.dot(wr_ref[...], z.astype(jnp.bfloat16),
                      preferred_element_type=jnp.float32) + br_ref[...]
        o_ref[...] = out.astype(o_ref.dtype)


def double_attention(x, params, *, spatial_tile=512, single_buffer_weights=True):
    """x: (B, C, H, W) float32.  Returns (B, c_m, H, W) float32."""
    B, C, H, W = x.shape
    N = H * W
    wa, ba, wb, bb, wv, bv, wr, br = params
    c_m = wa.shape[0]
    dn = wb.shape[0]

    # pad channels to sublane multiples, spatial to lane multiples
    c_m_p = _round_up(c_m, 8)
    dn_p = _round_up(dn, 8)
    c_p = _round_up(C, 8)
    k_p = c_m_p + 2 * dn_p

    if N <= spatial_tile:
        n_tile = _round_up(N, 128)
    else:
        n_tile = _round_up(spatial_tile, 128)
    n_pad = _round_up(N, n_tile)
    n_tiles = n_pad // n_tile

    def pad2(m, rows, cols):
        return jnp.pad(m, ((0, rows - m.shape[0]), (0, cols - m.shape[1])))

    # stacked [A; B; V] projection weights -> single fused matmul in-kernel
    w_stack = jnp.concatenate(
        [pad2(wa, c_m_p, c_p), pad2(wb, dn_p, c_p), pad2(wv, dn_p, c_p)],
        axis=0).astype(jnp.bfloat16)
    b_stack = jnp.concatenate(
        [jnp.pad(ba, (0, c_m_p - c_m)), jnp.pad(bb, (0, dn_p - dn)),
         jnp.pad(bv, (0, dn_p - dn))]).reshape(k_p, 1).astype(jnp.float32)
    wr_p = pad2(wr, c_m_p, c_m_p).astype(jnp.bfloat16)
    br_p = jnp.pad(br, (0, c_m_p - c_m)).reshape(c_m_p, 1).astype(jnp.float32)

    x_flat = jnp.pad(x.reshape(B, C, N),
                     ((0, 0), (0, c_p - C), (0, n_pad - N))).astype(jnp.bfloat16)

    kernel = functools.partial(_double_attention_kernel,
                               c_m_p=c_m_p, dn_p=dn_p, dn=dn,
                               n_true=N, n_pad=n_pad)

    # VMEM budget with headroom, clamped to v7x's 64 MiB physical VMEM.
    est = (2 * c_p * n_tile * 2                                    # x tile (bf16, dbl buf)
           + 2 * c_m_p * n_tile * 4                                # out tile (f32, dbl buf)
           + 2 * ((k_p * c_p + c_m_p * c_m_p) * 2 + (k_p + c_m_p) * 4)  # weights/biases
           + dn_p * c_m_p * 6 + 4 * dn_p * 128 * 4                 # scratch
           + (k_p + 2 * dn_p + 3 * c_m_p) * n_tile * 4)            # live intermediates
    vmem_limit = int(min(max(2 * est, 32 * 1024 * 1024), 64 * 1024 * 1024))

    def build(weight_pipeline_mode):
        def const_spec(shape):
            if weight_pipeline_mode is None:
                return pl.BlockSpec(shape, lambda b, p, t: (0, 0))
            return pl.BlockSpec(shape, lambda b, p, t: (0, 0),
                                pipeline_mode=weight_pipeline_mode)

        grid_spec = pltpu.PrefetchScalarGridSpec(
            num_scalar_prefetch=0,
            grid=(B, 2, n_tiles),
            in_specs=[
                pl.BlockSpec((pl.Squeezed(), c_p, n_tile), lambda b, p, t: (b, 0, t)),
                const_spec((k_p, c_p)),       # stacked projection weights
                const_spec((k_p, 1)),         # stacked projection biases
                const_spec((c_m_p, c_m_p)),   # reconstruct weight
                const_spec((c_m_p, 1)),       # reconstruct bias
            ],
            # Output blocks are only written in phase 1 (p == 1); during phase 0
            # the index stays pinned at tile 0 so no stale writeback occurs.
            out_specs=pl.BlockSpec((pl.Squeezed(), c_m_p, n_tile),
                                   lambda b, p, t: (b, 0, p * t)),
            scratch_shapes=[
                pltpu.VMEM((dn_p, c_m_p), jnp.float32),   # gathered descriptors (acc)
                pltpu.VMEM((c_m_p, dn_p), jnp.bfloat16),  # scaled/transposed descriptors
                pltpu.VMEM((dn_p, 1), jnp.float32),       # running max, softmax(B)
                pltpu.VMEM((dn_p, 1), jnp.float32),       # running sum, softmax(B)
                pltpu.VMEM((dn_p, 1), jnp.float32),       # running max, softmax(V)
                pltpu.VMEM((dn_p, 1), jnp.float32),       # running sum, softmax(V)
            ],
        )
        return pl.pallas_call(
            kernel,
            out_shape=jax.ShapeDtypeStruct((B, c_m_p, n_pad), jnp.float32),
            grid_spec=grid_spec,
            compiler_params=pltpu.CompilerParams(
                dimension_semantics=("parallel", "arbitrary", "arbitrary"),
                vmem_limit_bytes=vmem_limit),
        )

    args = (x_flat, w_stack, b_stack, wr_p, br_p)
    if single_buffer_weights:
        try:
            out_p = jax.block_until_ready(build(pl.Buffered(1))(*args))
        except Exception:  # pipeline_mode unsupported -> default double buffering
            out_p = build(None)(*args)
    else:
        out_p = build(None)(*args)

    return out_p[:, :c_m, :N].reshape(B, c_m, H, W)


def init_params(key, in_channels, out_channels=None, dn=None):
    c_m = in_channels if out_channels is None else out_channels
    d_n = in_channels if dn is None else dn
    ks = jax.random.split(key, 8)
    scale = 0.1
    wa = scale * jax.random.normal(ks[0], (c_m, in_channels), jnp.float32)
    ba = scale * jax.random.normal(ks[1], (c_m,), jnp.float32)
    wb = scale * jax.random.normal(ks[2], (d_n, in_channels), jnp.float32)
    bb = scale * jax.random.normal(ks[3], (d_n,), jnp.float32)
    wv = scale * jax.random.normal(ks[4], (d_n, in_channels), jnp.float32)
    bv = scale * jax.random.normal(ks[5], (d_n,), jnp.float32)
    wr = scale * jax.random.normal(ks[6], (c_m, c_m), jnp.float32)
    br = scale * jax.random.normal(ks[7], (c_m,), jnp.float32)
    return (wa, ba, wb, bb, wv, bv, wr, br)


def double_attention_ref(x, params):
    """Pure-JAX f32 reference reproducing the PyTorch forward semantics."""
    B, C, H, W = x.shape
    N = H * W
    wa, ba, wb, bb, wv, bv, wr, br = params
    c_m = wa.shape[0]
    xf = x.reshape(B, C, N)
    A = jnp.einsum('oc,bcn->bon', wa, xf) + ba[None, :, None]
    Bm = jnp.einsum('dc,bcn->bdn', wb, xf) + bb[None, :, None]
    Vm = jnp.einsum('dc,bcn->bdn', wv, xf) + bv[None, :, None]
    attn_maps = jax.nn.softmax(Bm, axis=-1)
    attn_vectors = jax.nn.softmax(Vm, axis=-1)
    glob = jnp.einsum('bon,bdn->bod', A, attn_maps)
    Z = jnp.einsum('bod,bdn->bon', glob, attn_vectors)
    Zr = jnp.einsum('po,bon->bpn', wr, Z) + br[None, :, None]
    return Zr.reshape(B, c_m, H, W)


if __name__ == "__main__":
    key = jax.random.PRNGKey(0)
    k_x1, k_p1, k_x2, k_p2 = jax.random.split(key, 4)

    # bf16 MXU inputs + approx-reciprocal softmax denominators => relaxed tolerance
    TOL = dict(atol=2e-2, rtol=2e-2)

    # Config 1: module-sized example (single spatial tile, padded channels / dn).
    B, C, H, W = 2, 4, 16, 16
    x1 = jax.random.normal(k_x1, (B, C, H, W), jnp.float32)
    p1 = init_params(k_p1, in_channels=C)          # out_channels = dn = C, reconstruct
    out1 = jax.block_until_ready(double_attention(x1, p1))
    ref1 = double_attention_ref(x1, p1)
    assert out1.shape == (B, C, H, W)
    assert jnp.allclose(out1, ref1, **TOL), "config1 mismatch vs reference"

    # Config 2: exercises the multi-tile (flash-style) spatial path + N padding.
    B2, C2, H2, W2 = 2, 8, 24, 24                  # N = 576 -> 3 tiles of 256
    x2 = jax.random.normal(k_x2, (B2, C2, H2, W2), jnp.float32)
    p2 = init_params(k_p2, in_channels=C2)
    out2 = jax.block_until_ready(double_attention(x2, p2, spatial_tile=256))
    ref2 = double_attention_ref(x2, p2)
    assert out2.shape == (B2, C2, H2, W2)
    assert jnp.allclose(out2, ref2, **TOL), "config2 mismatch vs reference"

    print("KERNEL_OK")
</pallas_src>

<mosaic_0001>
module attributes {stable_mosaic.version = 11 : i64} {
  func.func @_double_attention_kernel(%arg0: i32, %arg1: i32, %arg2: i32, %arg3: memref<1x8x256xbf16, #tpu.memory_space<vmem>>, %arg4: memref<24x8xbf16, #tpu.memory_space<vmem>>, %arg5: memref<24x1xf32, #tpu.memory_space<vmem>>, %arg6: memref<8x8xbf16, #tpu.memory_space<vmem>>, %arg7: memref<8x1xf32, #tpu.memory_space<vmem>>, %arg8: memref<1x8x256xf32, #tpu.memory_space<vmem>>, %arg9: memref<8x8xf32, #tpu.memory_space<vmem>>, %arg10: memref<8x8xbf16, #tpu.memory_space<vmem>>, %arg11: memref<8x1xf32, #tpu.memory_space<vmem>>, %arg12: memref<8x1xf32, #tpu.memory_space<vmem>>, %arg13: memref<8x1xf32, #tpu.memory_space<vmem>>, %arg14: memref<8x1xf32, #tpu.memory_space<vmem>>) attributes {dimension_semantics = [#tpu.dimension_semantics<parallel>, #tpu.dimension_semantics<arbitrary>, #tpu.dimension_semantics<arbitrary>], iteration_bounds = array<i64: 2, 2, 1>, scalar_prefetch = 0 : i64, scratch_operands = 6 : i64, tpu.core_type = #tpu.core_type<tc>, window_params = [{transform_indices = @transform_0, window_bounds = array<i64: 1, 8, 256>}, {pipeline_mode = #tpu.pipeline_mode<synchronous>, transform_indices = @transform_1, window_bounds = array<i64: 24, 8>}, {pipeline_mode = #tpu.pipeline_mode<synchronous>, transform_indices = @transform_2, window_bounds = array<i64: 24, 1>}, {pipeline_mode = #tpu.pipeline_mode<synchronous>, transform_indices = @transform_3, window_bounds = array<i64: 8, 8>}, {pipeline_mode = #tpu.pipeline_mode<synchronous>, transform_indices = @transform_4, window_bounds = array<i64: 8, 1>}, {transform_indices = @transform_5, window_bounds = array<i64: 1, 8, 256>}]} {
    %c0 = arith.constant 0 : index
    %c0_0 = arith.constant 0 : index
    %c0_1 = arith.constant 0 : index
    %0 = vector.load %arg3[%c0, %c0_0, %c0_1] : memref<1x8x256xbf16, #tpu.memory_space<vmem>>, vector<1x8x256xbf16>
    %1 = vector.shape_cast %0 : vector<1x8x256xbf16> to vector<8x256xbf16>
    %c0_i32 = arith.constant 0 : i32
    %2 = arith.cmpi eq, %arg1, %c0_i32 : i32
    %c0_i32_2 = arith.constant 0 : i32
    %3 = arith.cmpi eq, %arg2, %c0_i32_2 : i32
    %4 = arith.andi %2, %3 : i1
    %5 = arith.extui %4 : i1 to i32
    %c0_i32_3 = arith.constant 0 : i32
    %6 = arith.cmpi ne, %5, %c0_i32_3 : i32
    scf.if %6 {
      %cst = arith.constant 0xFF800000 : f32
      %18 = vector.broadcast %cst : f32 to vector<8x1xf32>
      %c0_10 = arith.constant 0 : index
      %c0_11 = arith.constant 0 : index
      %19 = vector.load %arg11[%c0_10, %c0_11] : memref<8x1xf32, #tpu.memory_space<vmem>>, vector<8x1xf32>
      tpu.vector_store %arg11[%c0_10, %c0_11], %18 {strides = array<i32>} : memref<8x1xf32, #tpu.memory_space<vmem>>, vector<8x1xf32>,
      %cst_12 = arith.constant 0.000000e+00 : f32
      %20 = vector.broadcast %cst_12 : f32 to vector<8x1xf32>
      %c0_13 = arith.constant 0 : index
      %c0_14 = arith.constant 0 : index
      %21 = vector.load %arg12[%c0_13, %c0_14] : memref<8x1xf32, #tpu.memory_space<vmem>>, vector<8x1xf32>
      tpu.vector_store %arg12[%c0_13, %c0_14], %20 {strides = array<i32>} : memref<8x1xf32, #tpu.memory_space<vmem>>, vector<8x1xf32>,
      %cst_15 = arith.constant 0xFF800000 : f32
      %22 = vector.broadcast %cst_15 : f32 to vector<8x1xf32>
      %c0_16 = arith.constant 0 : index
      %c0_17 = arith.constant 0 : index
      %23 = vector.load %arg13[%c0_16, %c0_17] : memref<8x1xf32, #tpu.memory_space<vmem>>, vector<8x1xf32>
      tpu.vector_store %arg13[%c0_16, %c0_17], %22 {strides = array<i32>} : memref<8x1xf32, #tpu.memory_space<vmem>>, vector<8x1xf32>,
      %cst_18 = arith.constant 0.000000e+00 : f32
      %24 = vector.broadcast %cst_18 : f32 to vector<8x1xf32>
      %c0_19 = arith.constant 0 : index
      %c0_20 = arith.constant 0 : index
      %25 = vector.load %arg14[%c0_19, %c0_20] : memref<8x1xf32, #tpu.memory_space<vmem>>, vector<8x1xf32>
      tpu.vector_store %arg14[%c0_19, %c0_20], %24 {strides = array<i32>} : memref<8x1xf32, #tpu.memory_space<vmem>>, vector<8x1xf32>,
      %cst_21 = arith.constant 0.000000e+00 : f32
      %26 = vector.broadcast %cst_21 : f32 to vector<8x8xf32>
      %c0_22 = arith.constant 0 : index
      %c0_23 = arith.constant 0 : index
      %27 = vector.load %arg9[%c0_22, %c0_23] : memref<8x8xf32, #tpu.memory_space<vmem>>, vector<8x8xf32>
      tpu.vector_store %arg9[%c0_22, %c0_23], %26 {strides = array<i32>} : memref<8x8xf32, #tpu.memory_space<vmem>>, vector<8x8xf32>,
    } else {
    }
    %c0_i32_4 = arith.constant 0 : i32
    %7 = arith.cmpi eq, %arg1, %c0_i32_4 : i32
    %8 = arith.extui %7 : i1 to i32
    %c0_i32_5 = arith.constant 0 : i32
    %9 = arith.cmpi ne, %8, %c0_i32_5 : i32
    scf.if %9 {
      %c0_10 = arith.constant 0 : index
      %c0_11 = arith.constant 0 : index
      %18 = vector.load %arg4[%c0_10, %c0_11] : memref<24x8xbf16, #tpu.memory_space<vmem>>, vector<24x8xbf16>
      %cst = arith.constant dense<0.000000e+00> : vector<24x256xf32>
      %19 = tpu.matmul %18, %1, %cst {dimension_numbers = #tpu.dot_dimension_numbers<[1], [0], [0], [1], [0, 0, 1, 1], [], []>} : vector<24x8xbf16>, vector<8x256xbf16>, vector<24x256xf32> -> vector<24x256xf32>
      %c0_12 = arith.constant 0 : index
      %c0_13 = arith.constant 0 : index
      %20 = vector.load %arg5[%c0_12, %c0_13] : memref<24x1xf32, #tpu.memory_space<vmem>>, vector<24x1xf32>
      %21 = vector.broadcast %20 : vector<24x1xf32> to vector<24x256xf32>
      %22 = arith.addf %19, %21 : vector<24x256xf32>
      %23 = vector.extract_strided_slice %22 {offsets = [0, 0], sizes = [8, 256], strides = [1, 1]} : vector<24x256xf32> to vector<8x256xf32>
      %24 = vector.extract_strided_slice %22 {offsets = [8, 0], sizes = [8, 256], strides = [1, 1]} : vector<24x256xf32> to vector<8x256xf32>
      %25 = vector.extract_strided_slice %22 {offsets = [16, 0], sizes = [8, 256], strides = [1, 1]} : vector<24x256xf32> to vector<8x256xf32>
      %c0_14 = arith.constant 0 : index
      %c0_15 = arith.constant 0 : index
      %26 = vector.load %arg11[%c0_14, %c0_15] : memref<8x1xf32, #tpu.memory_space<vmem>>, vector<8x1xf32>
      %cst_16 = arith.constant dense<0xFF800000> : vector<8xf32>
      %27 = vector.multi_reduction <maximumf>, %24, %cst_16 [1] : vector<8x256xf32> to vector<8xf32>
      %28 = vector.shape_cast %27 : vector<8xf32> to vector<8x1xf32>
      %29 = arith.maximumf %26, %28 : vector<8x1xf32>
      %c0_17 = arith.constant 0 : index
      %c0_18 = arith.constant 0 : index
      %30 = vector.load %arg11[%c0_17, %c0_18] : memref<8x1xf32, #tpu.memory_space<vmem>>, vector<8x1xf32>
      %31 = arith.subf %30, %29 : vector<8x1xf32>
      %32 = math.exp %31 : vector<8x1xf32>
      %33 = vector.broadcast %29 : vector<8x1xf32> to vector<8x256xf32>
      %34 = arith.subf %24, %33 : vector<8x256xf32>
      %35 = math.exp %34 : vector<8x256xf32>
      %c0_19 = arith.constant 0 : index
      %c0_20 = arith.constant 0 : index
      %36 = vector.load %arg12[%c0_19, %c0_20] : memref<8x1xf32, #tpu.memory_space<vmem>>, vector<8x1xf32>
      %37 = arith.mulf %32, %36 : vector<8x1xf32>
      %cst_21 = arith.constant dense<0.000000e+00> : vector<8xf32>
      %38 = vector.multi_reduction <add>, %35, %cst_21 [1] : vector<8x256xf32> to vector<8xf32>
      %39 = vector.shape_cast %38 : vector<8xf32> to vector<8x1xf32>
      %40 = arith.addf %37, %39 : vector<8x1xf32>
      %c0_22 = arith.constant 0 : index
      %c0_23 = arith.constant 0 : index
      %41 = vector.load %arg12[%c0_22, %c0_23] : memref<8x1xf32, #tpu.memory_space<vmem>>, vector<8x1xf32>
      tpu.vector_store %arg12[%c0_22, %c0_23], %40 {strides = array<i32>} : memref<8x1xf32, #tpu.memory_space<vmem>>, vector<8x1xf32>,
      %42 = arith.truncf %35 : vector<8x256xf32> to vector<8x256xbf16>
      %43 = arith.truncf %23 : vector<8x256xf32> to vector<8x256xbf16>
      %cst_24 = arith.constant dense<0.000000e+00> : vector<8x8xf32>
      %44 = tpu.matmul %42, %43, %cst_24 {dimension_numbers = #tpu.dot_dimension_numbers<[1], [1], [0], [0], [0, 0, 1, 0], [], []>} : vector<8x256xbf16>, vector<8x256xbf16>, vector<8x8xf32> -> vector<8x8xf32>
      %c0_25 = arith.constant 0 : index
      %c0_26 = arith.constant 0 : index
      %45 = vector.load %arg9[%c0_25, %c0_26] : memref<8x8xf32, #tpu.memory_space<vmem>>, vector<8x8xf32>
      %46 = vector.broadcast %32 : vector<8x1xf32> to vector<8x8xf32>
      %47 = arith.mulf %46, %45 : vector<8x8xf32>
      %48 = arith.addf %47, %44 : vector<8x8xf32>
      %c0_27 = arith.constant 0 : index
      %c0_28 = arith.constant 0 : index
      %49 = vector.load %arg9[%c0_27, %c0_28] : memref<8x8xf32, #tpu.memory_space<vmem>>, vector<8x8xf32>
      tpu.vector_store %arg9[%c0_27, %c0_28], %48 {strides = array<i32>} : memref<8x8xf32, #tpu.memory_space<vmem>>, vector<8x8xf32>,
      %c0_29 = arith.constant 0 : index
      %c0_30 = arith.constant 0 : index
      %50 = vector.load %arg11[%c0_29, %c0_30] : memref<8x1xf32, #tpu.memory_space<vmem>>, vector<8x1xf32>
      tpu.vector_store %arg11[%c0_29, %c0_30], %29 {strides = array<i32>} : memref<8x1xf32, #tpu.memory_space<vmem>>, vector<8x1xf32>,
      %c0_31 = arith.constant 0 : index
      %c0_32 = arith.constant 0 : index
      %51 = vector.load %arg13[%c0_31, %c0_32] : memref<8x1xf32, #tpu.memory_space<vmem>>, vector<8x1xf32>
      %cst_33 = arith.constant dense<0xFF800000> : vector<8xf32>
      %52 = vector.multi_reduction <maximumf>, %25, %cst_33 [1] : vector<8x256xf32> to vector<8xf32>
      %53 = vector.shape_cast %52 : vector<8xf32> to vector<8x1xf32>
      %54 = arith.maximumf %51, %53 : vector<8x1xf32>
      %55 = vector.broadcast %54 : vector<8x1xf32> to vector<8x256xf32>
      %56 = arith.subf %25, %55 : vector<8x256xf32>
      %57 = math.exp %56 : vector<8x256xf32>
      %c0_34 = arith.constant 0 : index
      %c0_35 = arith.constant 0 : index
      %58 = vector.load %arg13[%c0_34, %c0_35] : memref<8x1xf32, #tpu.memory_space<vmem>>, vector<8x1xf32>
      %59 = arith.subf %58, %54 : vector<8x1xf32>
      %60 = math.exp %59 : vector<8x1xf32>
      %c0_36 = arith.constant 0 : index
      %c0_37 = arith.constant 0 : index
      %61 = vector.load %arg14[%c0_36, %c0_37] : memref<8x1xf32, #tpu.memory_space<vmem>>, vector<8x1xf32>
      %62 = arith.mulf %60, %61 : vector<8x1xf32>
      %cst_38 = arith.constant dense<0.000000e+00> : vector<8xf32>
      %63 = vector.multi_reduction <add>, %57, %cst_38 [1] : vector<8x256xf32> to vector<8xf32>
      %64 = vector.shape_cast %63 : vector<8xf32> to vector<8x1xf32>
      %65 = arith.addf %62, %64 : vector<8x1xf32>
      %c0_39 = arith.constant 0 : index
      %c0_40 = arith.constant 0 : index
      %66 = vector.load %arg14[%c0_39, %c0_40] : memref<8x1xf32, #tpu.memory_space<vmem>>, vector<8x1xf32>
      tpu.vector_store %arg14[%c0_39, %c0_40], %65 {strides = array<i32>} : memref<8x1xf32, #tpu.memory_space<vmem>>, vector<8x1xf32>,
      %c0_41 = arith.constant 0 : index
      %c0_42 = arith.constant 0 : index
      %67 = vector.load %arg13[%c0_41, %c0_42] : memref<8x1xf32, #tpu.memory_space<vmem>>, vector<8x1xf32>
      tpu.vector_store %arg13[%c0_41, %c0_42], %54 {strides = array<i32>} : memref<8x1xf32, #tpu.memory_space<vmem>>, vector<8x1xf32>,
    } else {
    }
    %c0_i32_6 = arith.constant 0 : i32
    %10 = arith.cmpi eq, %arg1, %c0_i32_6 : i32
    %c0_i32_7 = arith.constant 0 : i32
    %11 = arith.cmpi eq, %arg2, %c0_i32_7 : i32
    %12 = arith.andi %10, %11 : i1
    %13 = arith.extui %12 : i1 to i32
    %c0_i32_8 = arith.constant 0 : i32
    %14 = arith.cmpi ne, %13, %c0_i32_8 : i32
    scf.if %14 {
      %c0_10 = arith.constant 0 : index
      %c0_11 = arith.constant 0 : index
      %18 = vector.load %arg12[%c0_10, %c0_11] : memref<8x1xf32, #tpu.memory_space<vmem>>, vector<8x1xf32>
      %c0_12 = arith.constant 0 : index
      %c0_13 = arith.constant 0 : index
      %19 = vector.load %arg14[%c0_12, %c0_13] : memref<8x1xf32, #tpu.memory_space<vmem>>, vector<8x1xf32>
      %20 = arith.mulf %18, %19 : vector<8x1xf32>
      %21 = tpu.reciprocal %20 {approx = true} : vector<8x1xf32> -> vector<8x1xf32>
      %22 = tpu.iota {dimensions = array<i32: 0>} : vector<8x1xi32>
      %c4_i32 = arith.constant 4 : i32
      %23 = vector.broadcast %c4_i32 : i32 to vector<8x1xi32>
      %24 = arith.cmpi slt, %22, %23 : vector<8x1xi32>
      %cst = arith.constant 0.000000e+00 : f32
      %25 = vector.broadcast %cst : f32 to vector<8x1xf32>
      %26 = arith.select %24, %21, %25 : vector<8x1xi1>, vector<8x1xf32>
      %c0_14 = arith.constant 0 : index
      %c0_15 = arith.constant 0 : index
      %27 = vector.load %arg9[%c0_14, %c0_15] : memref<8x8xf32, #tpu.memory_space<vmem>>, vector<8x8xf32>
      %28 = vector.broadcast %26 : vector<8x1xf32> to vector<8x8xf32>
      %29 = arith.mulf %27, %28 : vector<8x8xf32>
      %30 = tpu.transpose %29, [1, 0] : vector<8x8xf32> -> vector<8x8xf32>
      %31 = arith.truncf %30 : vector<8x8xf32> to vector<8x8xbf16>
      %c0_16 = arith.constant 0 : index
      %c0_17 = arith.constant 0 : index
      %32 = vector.load %arg10[%c0_16, %c0_17] : memref<8x8xbf16, #tpu.memory_space<vmem>>, vector<8x8xbf16>
      tpu.vector_store %arg10[%c0_16, %c0_17], %31 {strides = array<i32>} : memref<8x8xbf16, #tpu.memory_space<vmem>>, vector<8x8xbf16>,
    } else {
    }
    %c1_i32 = arith.constant 1 : i32
    %15 = arith.cmpi eq, %arg1, %c1_i32 : i32
    %16 = arith.extui %15 : i1 to i32
    %c0_i32_9 = arith.constant 0 : i32
    %17 = arith.cmpi ne, %16, %c0_i32_9 : i32
    scf.if %17 {
      %c16 = arith.constant 16 : index
      %c0_10 = arith.constant 0 : index
      %18 = vector.load %arg4[%c16, %c0_10] : memref<24x8xbf16, #tpu.memory_space<vmem>>, vector<8x8xbf16>
      %c16_11 = arith.constant 16 : index
      %c0_12 = arith.constant 0 : index
      %19 = vector.load %arg5[%c16_11, %c0_12] : memref<24x1xf32, #tpu.memory_space<vmem>>, vector<8x1xf32>
      %cst = arith.constant dense<0.000000e+00> : vector<8x256xf32>
      %20 = tpu.matmul %18, %1, %cst {dimension_numbers = #tpu.dot_dimension_numbers<[1], [0], [0], [1], [0, 0, 1, 1], [], []>} : vector<8x8xbf16>, vector<8x256xbf16>, vector<8x256xf32> -> vector<8x256xf32>
      %21 = vector.broadcast %19 : vector<8x1xf32> to vector<8x256xf32>
      %22 = arith.addf %20, %21 : vector<8x256xf32>
      %c0_13 = arith.constant 0 : index
      %c0_14 = arith.constant 0 : index
      %23 = vector.load %arg13[%c0_13, %c0_14] : memref<8x1xf32, #tpu.memory_space<vmem>>, vector<8x1xf32>
      %24 = vector.broadcast %23 : vector<8x1xf32> to vector<8x256xf32>
      %25 = arith.subf %22, %24 : vector<8x256xf32>
      %26 = math.exp %25 : vector<8x256xf32>
      %27 = arith.truncf %26 : vector<8x256xf32> to vector<8x256xbf16>
      %c0_15 = arith.constant 0 : index
      %c0_16 = arith.constant 0 : index
      %28 = vector.load %arg10[%c0_15, %c0_16] : memref<8x8xbf16, #tpu.memory_space<vmem>>, vector<8x8xbf16>
      %cst_17 = arith.constant dense<0.000000e+00> : vector<8x256xf32>
      %29 = tpu.matmul %28, %27, %cst_17 {dimension_numbers = #tpu.dot_dimension_numbers<[1], [0], [0], [1], [0, 0, 1, 1], [], []>} : vector<8x8xbf16>, vector<8x256xbf16>, vector<8x256xf32> -> vector<8x256xf32>
      %c0_18 = arith.constant 0 : index
      %c0_19 = arith.constant 0 : index
      %30 = vector.load %arg6[%c0_18, %c0_19] : memref<8x8xbf16, #tpu.memory_space<vmem>>, vector<8x8xbf16>
      %31 = arith.truncf %29 : vector<8x256xf32> to vector<8x256xbf16>
      %cst_20 = arith.constant dense<0.000000e+00> : vector<8x256xf32>
      %32 = tpu.matmul %30, %31, %cst_20 {dimension_numbers = #tpu.dot_dimension_numbers<[1], [0], [0], [1], [0, 0, 1, 1], [], []>} : vector<8x8xbf16>, vector<8x256xbf16>, vector<8x256xf32> -> vector<8x256xf32>
      %c0_21 = arith.constant 0 : index
      %c0_22 = arith.constant 0 : index
      %33 = vector.load %arg7[%c0_21, %c0_22] : memref<8x1xf32, #tpu.memory_space<vmem>>, vector<8x1xf32>
      %34 = vector.broadcast %33 : vector<8x1xf32> to vector<8x256xf32>
      %35 = arith.addf %32, %34 : vector<8x256xf32>
      %c0_23 = arith.constant 0 : index
      %c0_24 = arith.constant 0 : index
      %c0_25 = arith.constant 0 : index
      %36 = vector.load %arg8[%c0_23, %c0_24, %c0_25] : memref<1x8x256xf32, #tpu.memory_space<vmem>>, vector<1x8x256xf32>
      %37 = vector.shape_cast %36 : vector<1x8x256xf32> to vector<8x256xf32>
      %38 = vector.shape_cast %35 : vector<8x256xf32> to vector<1x8x256xf32>
      tpu.vector_store %arg8[%c0_23, %c0_24, %c0_25], %38 {strides = array<i32>} : memref<1x8x256xf32, #tpu.memory_space<vmem>>, vector<1x8x256xf32>,
    } else {
    }
    return
  }
  func.func @transform_0(%arg0: i32, %arg1: i32, %arg2: i32) -> (i32, i32, i32) {
    %c0_i32 = arith.constant 0 : i32
    %c0_i32_0 = arith.constant 0 : i32
    return %arg0, %c0_i32, %arg2 : i32, i32, i32
  }
  func.func @transform_1(%arg0: i32, %arg1: i32, %arg2: i32) -> (i32, i32) {
    %c0_i32 = arith.constant 0 : i32
    %c0_i32_0 = arith.constant 0 : i32
    %c0_i32_1 = arith.constant 0 : i32
    return %c0_i32, %c0_i32_0 : i32, i32
  }
  func.func @transform_2(%arg0: i32, %arg1: i32, %arg2: i32) -> (i32, i32) {
    %c0_i32 = arith.constant 0 : i32
    %c0_i32_0 = arith.constant 0 : i32
    %c0_i32_1 = arith.constant 0 : i32
    return %c0_i32, %c0_i32_0 : i32, i32
  }
  func.func @transform_3(%arg0: i32, %arg1: i32, %arg2: i32) -> (i32, i32) {
    %c0_i32 = arith.constant 0 : i32
    %c0_i32_0 = arith.constant 0 : i32
    %c0_i32_1 = arith.constant 0 : i32
    return %c0_i32, %c0_i32_0 : i32, i32
  }
  func.func @transform_4(%arg0: i32, %arg1: i32, %arg2: i32) -> (i32, i32) {
    %c0_i32 = arith.constant 0 : i32
    %c0_i32_0 = arith.constant 0 : i32
    %c0_i32_1 = arith.constant 0 : i32
    return %c0_i32, %c0_i32_0 : i32, i32
  }
  func.func @transform_5(%arg0: i32, %arg1: i32, %arg2: i32) -> (i32, i32, i32) {
    %0 = arith.muli %arg1, %arg2 : i32
    %c0_i32 = arith.constant 0 : i32
    %c0_i32_0 = arith.constant 0 : i32
    return %arg0, %c0_i32, %0 : i32, i32, i32
  }
}

module attributes {stable_mosaic.version = 11 : i64} {
  func.func @_double_attention_kernel(%arg0: i32, %arg1: i32, %arg2: i32, %arg3: memref<1x8x256xbf16, #tpu.memory_space<vmem>>, %arg4: memref<24x8xbf16, #tpu.memory_space<vmem>>, %arg5: memref<24x1xf32, #tpu.memory_space<vmem>>, %arg6: memref<8x8xbf16, #tpu.memory_space<vmem>>, %arg7: memref<8x1xf32, #tpu.memory_space<vmem>>, %arg8: memref<1x8x256xf32, #tpu.memory_space<vmem>>, %arg9: memref<8x8xf32, #tpu.memory_space<vmem>>, %arg10: memref<8x8xbf16, #tpu.memory_space<vmem>>, %arg11: memref<8x1xf32, #tpu.memory_space<vmem>>, %arg12: memref<8x1xf32, #tpu.memory_space<vmem>>, %arg13: memref<8x1xf32, #tpu.memory_space<vmem>>, %arg14: memref<8x1xf32, #tpu.memory_space<vmem>>) attributes {dimension_semantics = [#tpu.dimension_semantics<parallel>, #tpu.dimension_semantics<arbitrary>, #tpu.dimension_semantics<arbitrary>], iteration_bounds = array<i64: 2, 2, 1>, scalar_prefetch = 0 : i64, scratch_operands = 6 : i64, tpu.core_type = #tpu.core_type<tc>, window_params = [{transform_indices = @transform_0, window_bounds = array<i64: 1, 8, 256>}, {pipeline_mode = #tpu.pipeline_mode<synchronous>, transform_indices = @transform_1, window_bounds = array<i64: 24, 8>}, {pipeline_mode = #tpu.pipeline_mode<synchronous>, transform_indices = @transform_2, window_bounds = array<i64: 24, 1>}, {pipeline_mode = #tpu.pipeline_mode<synchronous>, transform_indices = @transform_3, window_bounds = array<i64: 8, 8>}, {pipeline_mode = #tpu.pipeline_mode<synchronous>, transform_indices = @transform_4, window_bounds = array<i64: 8, 1>}, {transform_indices = @transform_5, window_bounds = array<i64: 1, 8, 256>}]} {
    %c0 = arith.constant 0 : index
    %c0_0 = arith.constant 0 : index
    %c0_1 = arith.constant 0 : index
    %0 = vector.load %arg3[%c0, %c0_0, %c0_1] : memref<1x8x256xbf16, #tpu.memory_space<vmem>>, vector<1x8x256xbf16>
    %1 = vector.shape_cast %0 : vector<1x8x256xbf16> to vector<8x256xbf16>
    %c0_i32 = arith.constant 0 : i32
    %2 = arith.cmpi eq, %arg1, %c0_i32 : i32
    %c0_i32_2 = arith.constant 0 : i32
    %3 = arith.cmpi eq, %arg2, %c0_i32_2 : i32
    %4 = arith.andi %2, %3 : i1
    %5 = arith.extui %4 : i1 to i32
    %c0_i32_3 = arith.constant 0 : i32
    %6 = arith.cmpi ne, %5, %c0_i32_3 : i32
    scf.if %6 {
      %cst = arith.constant 0xFF800000 : f32
      %18 = vector.broadcast %cst : f32 to vector<8x1xf32>
      %c0_10 = arith.constant 0 : index
      %c0_11 = arith.constant 0 : index
      %19 = vector.load %arg11[%c0_10, %c0_11] : memref<8x1xf32, #tpu.memory_space<vmem>>, vector<8x1xf32>
      tpu.vector_store %arg11[%c0_10, %c0_11], %18 {strides = array<i32>} : memref<8x1xf32, #tpu.memory_space<vmem>>, vector<8x1xf32>,
      %cst_12 = arith.constant 0.000000e+00 : f32
      %20 = vector.broadcast %cst_12 : f32 to vector<8x1xf32>
      %c0_13 = arith.constant 0 : index
      %c0_14 = arith.constant 0 : index
      %21 = vector.load %arg12[%c0_13, %c0_14] : memref<8x1xf32, #tpu.memory_space<vmem>>, vector<8x1xf32>
      tpu.vector_store %arg12[%c0_13, %c0_14], %20 {strides = array<i32>} : memref<8x1xf32, #tpu.memory_space<vmem>>, vector<8x1xf32>,
      %cst_15 = arith.constant 0xFF800000 : f32
      %22 = vector.broadcast %cst_15 : f32 to vector<8x1xf32>
      %c0_16 = arith.constant 0 : index
      %c0_17 = arith.constant 0 : index
      %23 = vector.load %arg13[%c0_16, %c0_17] : memref<8x1xf32, #tpu.memory_space<vmem>>, vector<8x1xf32>
      tpu.vector_store %arg13[%c0_16, %c0_17], %22 {strides = array<i32>} : memref<8x1xf32, #tpu.memory_space<vmem>>, vector<8x1xf32>,
      %cst_18 = arith.constant 0.000000e+00 : f32
      %24 = vector.broadcast %cst_18 : f32 to vector<8x1xf32>
      %c0_19 = arith.constant 0 : index
      %c0_20 = arith.constant 0 : index
      %25 = vector.load %arg14[%c0_19, %c0_20] : memref<8x1xf32, #tpu.memory_space<vmem>>, vector<8x1xf32>
      tpu.vector_store %arg14[%c0_19, %c0_20], %24 {strides = array<i32>} : memref<8x1xf32, #tpu.memory_space<vmem>>, vector<8x1xf32>,
      %cst_21 = arith.constant 0.000000e+00 : f32
      %26 = vector.broadcast %cst_21 : f32 to vector<8x8xf32>
      %c0_22 = arith.constant 0 : index
      %c0_23 = arith.constant 0 : index
      %27 = vector.load %arg9[%c0_22, %c0_23] : memref<8x8xf32, #tpu.memory_space<vmem>>, vector<8x8xf32>
      tpu.vector_store %arg9[%c0_22, %c0_23], %26 {strides = array<i32>} : memref<8x8xf32, #tpu.memory_space<vmem>>, vector<8x8xf32>,
    } else {
    }
    %c0_i32_4 = arith.constant 0 : i32
    %7 = arith.cmpi eq, %arg1, %c0_i32_4 : i32
    %8 = arith.extui %7 : i1 to i32
    %c0_i32_5 = arith.constant 0 : i32
    %9 = arith.cmpi ne, %8, %c0_i32_5 : i32
    scf.if %9 {
      %c0_10 = arith.constant 0 : index
      %c0_11 = arith.constant 0 : index
      %18 = vector.load %arg4[%c0_10, %c0_11] : memref<24x8xbf16, #tpu.memory_space<vmem>>, vector<24x8xbf16>
      %cst = arith.constant dense<0.000000e+00> : vector<24x256xf32>
      %19 = tpu.matmul %18, %1, %cst {dimension_numbers = #tpu.dot_dimension_numbers<[1], [0], [0], [1], [0, 0, 1, 1], [], []>} : vector<24x8xbf16>, vector<8x256xbf16>, vector<24x256xf32> -> vector<24x256xf32>
      %c0_12 = arith.constant 0 : index
      %c0_13 = arith.constant 0 : index
      %20 = vector.load %arg5[%c0_12, %c0_13] : memref<24x1xf32, #tpu.memory_space<vmem>>, vector<24x1xf32>
      %21 = vector.broadcast %20 : vector<24x1xf32> to vector<24x256xf32>
      %22 = arith.addf %19, %21 : vector<24x256xf32>
      %23 = vector.extract_strided_slice %22 {offsets = [0, 0], sizes = [8, 256], strides = [1, 1]} : vector<24x256xf32> to vector<8x256xf32>
      %24 = vector.extract_strided_slice %22 {offsets = [8, 0], sizes = [8, 256], strides = [1, 1]} : vector<24x256xf32> to vector<8x256xf32>
      %25 = vector.extract_strided_slice %22 {offsets = [16, 0], sizes = [8, 256], strides = [1, 1]} : vector<24x256xf32> to vector<8x256xf32>
      %c0_14 = arith.constant 0 : index
      %c0_15 = arith.constant 0 : index
      %26 = vector.load %arg11[%c0_14, %c0_15] : memref<8x1xf32, #tpu.memory_space<vmem>>, vector<8x1xf32>
      %cst_16 = arith.constant dense<0xFF800000> : vector<8xf32>
      %27 = vector.multi_reduction <maximumf>, %24, %cst_16 [1] : vector<8x256xf32> to vector<8xf32>
      %28 = vector.shape_cast %27 : vector<8xf32> to vector<8x1xf32>
      %29 = arith.maximumf %26, %28 : vector<8x1xf32>
      %c0_17 = arith.constant 0 : index
      %c0_18 = arith.constant 0 : index
      %30 = vector.load %arg11[%c0_17, %c0_18] : memref<8x1xf32, #tpu.memory_space<vmem>>, vector<8x1xf32>
      %31 = arith.subf %30, %29 : vector<8x1xf32>
      %32 = math.exp %31 : vector<8x1xf32>
      %33 = vector.broadcast %29 : vector<8x1xf32> to vector<8x256xf32>
      %34 = arith.subf %24, %33 : vector<8x256xf32>
      %35 = math.exp %34 : vector<8x256xf32>
      %c0_19 = arith.constant 0 : index
      %c0_20 = arith.constant 0 : index
      %36 = vector.load %arg12[%c0_19, %c0_20] : memref<8x1xf32, #tpu.memory_space<vmem>>, vector<8x1xf32>
      %37 = arith.mulf %32, %36 : vector<8x1xf32>
      %cst_21 = arith.constant dense<0.000000e+00> : vector<8xf32>
      %38 = vector.multi_reduction <add>, %35, %cst_21 [1] : vector<8x256xf32> to vector<8xf32>
      %39 = vector.shape_cast %38 : vector<8xf32> to vector<8x1xf32>
      %40 = arith.addf %37, %39 : vector<8x1xf32>
      %c0_22 = arith.constant 0 : index
      %c0_23 = arith.constant 0 : index
      %41 = vector.load %arg12[%c0_22, %c0_23] : memref<8x1xf32, #tpu.memory_space<vmem>>, vector<8x1xf32>
      tpu.vector_store %arg12[%c0_22, %c0_23], %40 {strides = array<i32>} : memref<8x1xf32, #tpu.memory_space<vmem>>, vector<8x1xf32>,
      %42 = arith.truncf %35 : vector<8x256xf32> to vector<8x256xbf16>
      %43 = arith.truncf %23 : vector<8x256xf32> to vector<8x256xbf16>
      %cst_24 = arith.constant dense<0.000000e+00> : vector<8x8xf32>
      %44 = tpu.matmul %42, %43, %cst_24 {dimension_numbers = #tpu.dot_dimension_numbers<[1], [1], [0], [0], [0, 0, 1, 0], [], []>} : vector<8x256xbf16>, vector<8x256xbf16>, vector<8x8xf32> -> vector<8x8xf32>
      %c0_25 = arith.constant 0 : index
      %c0_26 = arith.constant 0 : index
      %45 = vector.load %arg9[%c0_25, %c0_26] : memref<8x8xf32, #tpu.memory_space<vmem>>, vector<8x8xf32>
      %46 = vector.broadcast %32 : vector<8x1xf32> to vector<8x8xf32>
      %47 = arith.mulf %46, %45 : vector<8x8xf32>
      %48 = arith.addf %47, %44 : vector<8x8xf32>
      %c0_27 = arith.constant 0 : index
      %c0_28 = arith.constant 0 : index
      %49 = vector.load %arg9[%c0_27, %c0_28] : memref<8x8xf32, #tpu.memory_space<vmem>>, vector<8x8xf32>
      tpu.vector_store %arg9[%c0_27, %c0_28], %48 {strides = array<i32>} : memref<8x8xf32, #tpu.memory_space<vmem>>, vector<8x8xf32>,
      %c0_29 = arith.constant 0 : index
      %c0_30 = arith.constant 0 : index
      %50 = vector.load %arg11[%c0_29, %c0_30] : memref<8x1xf32, #tpu.memory_space<vmem>>, vector<8x1xf32>
      tpu.vector_store %arg11[%c0_29, %c0_30], %29 {strides = array<i32>} : memref<8x1xf32, #tpu.memory_space<vmem>>, vector<8x1xf32>,
      %c0_31 = arith.constant 0 : index
      %c0_32 = arith.constant 0 : index
      %51 = vector.load %arg13[%c0_31, %c0_32] : memref<8x1xf32, #tpu.memory_space<vmem>>, vector<8x1xf32>
      %cst_33 = arith.constant dense<0xFF800000> : vector<8xf32>
      %52 = vector.multi_reduction <maximumf>, %25, %cst_33 [1] : vector<8x256xf32> to vector<8xf32>
      %53 = vector.shape_cast %52 : vector<8xf32> to vector<8x1xf32>
      %54 = arith.maximumf %51, %53 : vector<8x1xf32>
      %55 = vector.broadcast %54 : vector<8x1xf32> to vector<8x256xf32>
      %56 = arith.subf %25, %55 : vector<8x256xf32>
      %57 = math.exp %56 : vector<8x256xf32>
      %c0_34 = arith.constant 0 : index
      %c0_35 = arith.constant 0 : index
      %58 = vector.load %arg13[%c0_34, %c0_35] : memref<8x1xf32, #tpu.memory_space<vmem>>, vector<8x1xf32>
      %59 = arith.subf %58, %54 : vector<8x1xf32>
      %60 = math.exp %59 : vector<8x1xf32>
      %c0_36 = arith.constant 0 : index
      %c0_37 = arith.constant 0 : index
      %61 = vector.load %arg14[%c0_36, %c0_37] : memref<8x1xf32, #tpu.memory_space<vmem>>, vector<8x1xf32>
      %62 = arith.mulf %60, %61 : vector<8x1xf32>
      %cst_38 = arith.constant dense<0.000000e+00> : vector<8xf32>
      %63 = vector.multi_reduction <add>, %57, %cst_38 [1] : vector<8x256xf32> to vector<8xf32>
      %64 = vector.shape_cast %63 : vector<8xf32> to vector<8x1xf32>
      %65 = arith.addf %62, %64 : vector<8x1xf32>
      %c0_39 = arith.constant 0 : index
      %c0_40 = arith.constant 0 : index
      %66 = vector.load %arg14[%c0_39, %c0_40] : memref<8x1xf32, #tpu.memory_space<vmem>>, vector<8x1xf32>
      tpu.vector_store %arg14[%c0_39, %c0_40], %65 {strides = array<i32>} : memref<8x1xf32, #tpu.memory_space<vmem>>, vector<8x1xf32>,
      %c0_41 = arith.constant 0 : index
      %c0_42 = arith.constant 0 : index
      %67 = vector.load %arg13[%c0_41, %c0_42] : memref<8x1xf32, #tpu.memory_space<vmem>>, vector<8x1xf32>
      tpu.vector_store %arg13[%c0_41, %c0_42], %54 {strides = array<i32>} : memref<8x1xf32, #tpu.memory_space<vmem>>, vector<8x1xf32>,
    } else {
    }
    %c0_i32_6 = arith.constant 0 : i32
    %10 = arith.cmpi eq, %arg1, %c0_i32_6 : i32
    %c0_i32_7 = arith.constant 0 : i32
    %11 = arith.cmpi eq, %arg2, %c0_i32_7 : i32
    %12 = arith.andi %10, %11 : i1
    %13 = arith.extui %12 : i1 to i32
    %c0_i32_8 = arith.constant 0 : i32
    %14 = arith.cmpi ne, %13, %c0_i32_8 : i32
    scf.if %14 {
      %c0_10 = arith.constant 0 : index
      %c0_11 = arith.constant 0 : index
      %18 = vector.load %arg12[%c0_10, %c0_11] : memref<8x1xf32, #tpu.memory_space<vmem>>, vector<8x1xf32>
      %c0_12 = arith.constant 0 : index
      %c0_13 = arith.constant 0 : index
      %19 = vector.load %arg14[%c0_12, %c0_13] : memref<8x1xf32, #tpu.memory_space<vmem>>, vector<8x1xf32>
      %20 = arith.mulf %18, %19 : vector<8x1xf32>
      %21 = tpu.reciprocal %20 {approx = true} : vector<8x1xf32> -> vector<8x1xf32>
      %22 = tpu.iota {dimensions = array<i32: 0>} : vector<8x1xi32>
      %c4_i32 = arith.constant 4 : i32
      %23 = vector.broadcast %c4_i32 : i32 to vector<8x1xi32>
      %24 = arith.cmpi slt, %22, %23 : vector<8x1xi32>
      %cst = arith.constant 0.000000e+00 : f32
      %25 = vector.broadcast %cst : f32 to vector<8x1xf32>
      %26 = arith.select %24, %21, %25 : vector<8x1xi1>, vector<8x1xf32>
      %c0_14 = arith.constant 0 : index
      %c0_15 = arith.constant 0 : index
      %27 = vector.load %arg9[%c0_14, %c0_15] : memref<8x8xf32, #tpu.memory_space<vmem>>, vector<8x8xf32>
      %28 = vector.broadcast %26 : vector<8x1xf32> to vector<8x8xf32>
      %29 = arith.mulf %27, %28 : vector<8x8xf32>
      %30 = tpu.transpose %29, [1, 0] : vector<8x8xf32> -> vector<8x8xf32>
      %31 = arith.truncf %30 : vector<8x8xf32> to vector<8x8xbf16>
      %c0_16 = arith.constant 0 : index
      %c0_17 = arith.constant 0 : index
      %32 = vector.load %arg10[%c0_16, %c0_17] : memref<8x8xbf16, #tpu.memory_space<vmem>>, vector<8x8xbf16>
      tpu.vector_store %arg10[%c0_16, %c0_17], %31 {strides = array<i32>} : memref<8x8xbf16, #tpu.memory_space<vmem>>, vector<8x8xbf16>,
    } else {
    }
    %c1_i32 = arith.constant 1 : i32
    %15 = arith.cmpi eq, %arg1, %c1_i32 : i32
    %16 = arith.extui %15 : i1 to i32
    %c0_i32_9 = arith.constant 0 : i32
    %17 = arith.cmpi ne, %16, %c0_i32_9 : i32
    scf.if %17 {
      %c16 = arith.constant 16 : index
      %c0_10 = arith.constant 0 : index
      %18 = vector.load %arg4[%c16, %c0_10] : memref<24x8xbf16, #tpu.memory_space<vmem>>, vector<8x8xbf16>
      %c16_11 = arith.constant 16 : index
      %c0_12 = arith.constant 0 : index
      %19 = vector.load %arg5[%c16_11, %c0_12] : memref<24x1xf32, #tpu.memory_space<vmem>>, vector<8x1xf32>
      %cst = arith.constant dense<0.000000e+00> : vector<8x256xf32>
      %20 = tpu.matmul %18, %1, %cst {dimension_numbers = #tpu.dot_dimension_numbers<[1], [0], [0], [1], [0, 0, 1, 1], [], []>} : vector<8x8xbf16>, vector<8x256xbf16>, vector<8x256xf32> -> vector<8x256xf32>
      %21 = vector.broadcast %19 : vector<8x1xf32> to vector<8x256xf32>
      %22 = arith.addf %20, %21 : vector<8x256xf32>
      %c0_13 = arith.constant 0 : index
      %c0_14 = arith.constant 0 : index
      %23 = vector.load %arg13[%c0_13, %c0_14] : memref<8x1xf32, #tpu.memory_space<vmem>>, vector<8x1xf32>
      %24 = vector.broadcast %23 : vector<8x1xf32> to vector<8x256xf32>
      %25 = arith.subf %22, %24 : vector<8x256xf32>
      %26 = math.exp %25 : vector<8x256xf32>
      %27 = arith.truncf %26 : vector<8x256xf32> to vector<8x256xbf16>
      %c0_15 = arith.constant 0 : index
      %c0_16 = arith.constant 0 : index
      %28 = vector.load %arg10[%c0_15, %c0_16] : memref<8x8xbf16, #tpu.memory_space<vmem>>, vector<8x8xbf16>
      %cst_17 = arith.constant dense<0.000000e+00> : vector<8x256xf32>
      %29 = tpu.matmul %28, %27, %cst_17 {dimension_numbers = #tpu.dot_dimension_numbers<[1], [0], [0], [1], [0, 0, 1, 1], [], []>} : vector<8x8xbf16>, vector<8x256xbf16>, vector<8x256xf32> -> vector<8x256xf32>
      %c0_18 = arith.constant 0 : index
      %c0_19 = arith.constant 0 : index
      %30 = vector.load %arg6[%c0_18, %c0_19] : memref<8x8xbf16, #tpu.memory_space<vmem>>, vector<8x8xbf16>
      %31 = arith.truncf %29 : vector<8x256xf32> to vector<8x256xbf16>
      %cst_20 = arith.constant dense<0.000000e+00> : vector<8x256xf32>
      %32 = tpu.matmul %30, %31, %cst_20 {dimension_numbers = #tpu.dot_dimension_numbers<[1], [0], [0], [1], [0, 0, 1, 1], [], []>} : vector<8x8xbf16>, vector<8x256xbf16>, vector<8x256xf32> -> vector<8x256xf32>
      %c0_21 = arith.constant 0 : index
      %c0_22 = arith.constant 0 : index
      %33 = vector.load %arg7[%c0_21, %c0_22] : memref<8x1xf32, #tpu.memory_space<vmem>>, vector<8x1xf32>
      %34 = vector.broadcast %33 : vector<8x1xf32> to vector<8x256xf32>
      %35 = arith.addf %32, %34 : vector<8x256xf32>
      %c0_23 = arith.constant 0 : index
      %c0_24 = arith.constant 0 : index
      %c0_25 = arith.constant 0 : index
      %36 = vector.load %arg8[%c0_23, %c0_24, %c0_25] : memref<1x8x256xf32, #tpu.memory_space<vmem>>, vector<1x8x256xf32>
      %37 = vector.shape_cast %36 : vector<1x8x256xf32> to vector<8x256xf32>
      %38 = vector.shape_cast %35 : vector<8x256xf32> to vector<1x8x256xf32>
      tpu.vector_store %arg8[%c0_23, %c0_24, %c0_25], %38 {strides = array<i32>} : memref<1x8x256xf32, #tpu.memory_space<vmem>>, vector<1x8x256xf32>,
    } else {
    }
    return
  }
  func.func @transform_0(%arg0: i32, %arg1: i32, %arg2: i32) -> (i32, i32, i32) {
    %c0_i32 = arith.constant 0 : i32
    %c0_i32_0 = arith.constant 0 : i32
    return %arg0, %c0_i32, %arg2 : i32, i32, i32
  }
  func.func @transform_1(%arg0: i32, %arg1: i32, %arg2: i32) -> (i32, i32) {
    %c0_i32 = arith.constant 0 : i32
    %c0_i32_0 = arith.constant 0 : i32
    %c0_i32_1 = arith.constant 0 : i32
    return %c0_i32, %c0_i32_0 : i32, i32
  }
  func.func @transform_2(%arg0: i32, %arg1: i32, %arg2: i32) -> (i32, i32) {
    %c0_i32 = arith.constant 0 : i32
    %c0_i32_0 = arith.constant 0 : i32
    %c0_i32_1 = arith.constant 0 : i32
    return %c0_i32, %c0_i32_0 : i32, i32
  }
  func.func @transform_3(%arg0: i32, %arg1: i32, %arg2: i32) -> (i32, i32) {
    %c0_i32 = arith.constant 0 : i32
    %c0_i32_0 = arith.constant 0 : i32
    %c0_i32_1 = arith.constant 0 : i32
    return %c0_i32, %c0_i32_0 : i32, i32
  }
  func.func @transform_4(%arg0: i32, %arg1: i32, %arg2: i32) -> (i32, i32) {
    %c0_i32 = arith.constant 0 : i32
    %c0_i32_0 = arith.constant 0 : i32
    %c0_i32_1 = arith.constant 0 : i32
    return %c0_i32, %c0_i32_0 : i32, i32
  }
  func.func @transform_5(%arg0: i32, %arg1: i32, %arg2: i32) -> (i32, i32, i32) {
    %0 = arith.muli %arg1, %arg2 : i32
    %c0_i32 = arith.constant 0 : i32
    %c0_i32_0 = arith.constant 0 : i32
    return %arg0, %c0_i32, %0 : i32, i32, i32
  }
}

</mosaic_0001>

<bundles_post_ra>
// kernel: tpu_custom_call.1
= control target key start
LH: loop header
LB: loop body
LE: loop exit
PB: predicated region body
PF: predicated region fallthrough
CT: control target
= control target key end

     0   :  { %10 = vsyncpa [#allocation9], 0  ;;  %s1298_s0 = inlined_call_operand.vmem [shape: bf16[2,8,256], index: 0, kind: input, shape index: {}]   ;;  %s1299_s1 = inlined_call_operand.vmem [shape: bf16[24,8], index: 1, kind: input, shape index: {}]   ;;  %s1300_s2 = inlined_call_operand.vmem [shape: f32[24,1], index: 2, kind: input, shape index: {}]   ;;  %s1301_s3 = inlined_call_operand.vmem [shape: bf16[8,8], index: 3, kind: input, shape index: {}]   ;;  %s1302_s4 = inlined_call_operand.vmem [shape: f32[8,1], index: 4, kind: input, shape index: {}]   ;;  %s1303_s5 = inlined_call_operand.hbm [shape: f32[2,8,256], index: 5, kind: output, shape index: {}]  }
   0x1   :  { %12 = vsyncpa [#allocation9 + $0x1], 0  ;;  %s1103_s18 = smov 0   ;;  %s1105_s19 = smov 0  }
   0x2   :  { %s1107_s20 = smov 0   ;;  %s1109_s21 = smov 0  }
   0x3   :  { %s1111_s22 = smov 0   ;;  %s1113_s23 = smov 0  }
   0x4   :  { %s1115_s24 = smov 0   ;;  %s1117_s25 = smov 0  }
   0x5 LB: > { %s835_s26 = sadd.s32 4294967295, %s1065_s25   ;;  %s836_s27 = sadd.s32 4294967294, %s1065_s25   ;;  %s1065_s25 = sphi %s1117_s25, %s18_s25   ;;  %s1061_s24 = sphi %s1115_s24, %s1312_s24   ;;  %s1057_s23 = sphi %s1113_s23, %s1311_s23   ;;  %s1053_s22 = sphi %s1111_s22, %s1310_s22   ;;  %s1049_s21 = sphi %s1109_s21, %s1309_s21   ;;  %s1045_s20 = sphi %s1107_s20, %s1308_s20   ;;  %s1041_s19 = sphi %s1105_s19, %s1307_s19   ;;  %s1037_s18 = sphi %s1103_s18, %s1306_s18  }
   0x6   : > { %s33_s28 = sadd.s32 1, %s1057_s23  ;;  %s37_s29 = sadd.s32 1, %s1061_s24 }
   0x7   : > { %p35_p0 = scmp.ge.s32.totalorder %s33_s28, 2  ;;  %p170_p1 = scmp.ne.s32.totalorder %s1045_s20, %s1041_s19 }
   0x8   : > { %p171_p2 = scmp.eq.s32.totalorder %s835_s26, 3  ;;  %p176_p4 = scmp.ne.s32.totalorder %s1041_s19, %s1037_s18 }
   0x9   : > { %s1314_s28 = smov (%p35_p0, %s33_s28), 0  ;;  %s1316_s29 = smov (!%p35_p0, %s37_s29), %s1061_s24 }
   0xa   : > { %p1152_p3 = por %p171_p2, %p170_p1  ;;  %p39_p5 = scmp.ge.s32.totalorder %s1316_s29, 2 }
   0xb   : > { %p177_p6 = scmp.eq.s32.totalorder %s836_s27, 3  ;;  %p839_p7 = scmp.ge.s32.totalorder %s1065_s25, 1 }
   0xc   : > { %p220_p8 = scmp.lt.s32.totalorder %s1065_s25, 5  ;;  %s1318_s29 = smov (%p39_p5, %s1316_s29), 0 }
   0xd   : > { %p1162_p9 = por %p177_p6, %p176_p4  ;;  %s155_s7 = ssub.s32 %s1061_s24, %s1318_s29 }
   0xe   : > { %p221_p10 = pnand %p839_p7, %p220_p8  ;;  %s160_s8 = sadd.s32 1, %s1045_s20 }
   0xf   : > { %p158_p11 = scmp.eq.s32.totalorder %s155_s7, 0  ;;  %s249_s10 = sand.u32 (!%p221_p10), 1, %s1041_s19  }
  0x10   : > { %224 = sbr.rel (%p221_p10) target bundleno = 1861 (0x745), region = 40  ;;  %p253_p12 = scmp.lt.s32.totalorder (!%p221_p10), %s1053_s22, 1 }
  0x11   : > { %s1170_s9 = scalar_select %p158_p11, %s1045_s20, %s160_s8  }
  0x12   : > { %s840_s11 = sshll.u32 (!%p221_p10), %s249_s10, 4  ;;  %p266_p13 = scmp.eq.s32.totalorder (!%p221_p10), %s1049_s21, 0 }
  0x13   : > { %s1183_s17 = scalar_lea.vmem (!%p221_p10), [#allocation8], %s840_s11 }
  0x17   : > { %s254_s12 = scalar_select %p253_p12, %s1053_s22, 1 }
  0x18   : > { %271 = sbr.rel (!%p266_p13) target bundleno = 31 (0x1f), region = 44  ;;  %vm272_vm0 = vcmask (%p266_p13), 7168   ;;  %vm277_vm1 = vcmask (%p266_p13), 64512   ;;  %v1067_v1 = vmov (%p266_p13), -inf   ;;  %v1068_v2 = vmov (%p266_p13), 0.0  }
  0x19   : > { %s866_s13 = sshll.u32 %s254_s12, 3  ;;  %273 = vst.msk [vmem:[#allocation4] sm:$0xff] (%p266_p13), %vm272_vm0, %v1067_v1  ;;  %275 = vst.msk [vmem:[#allocation6] sm:$0xff] (%p266_p13), %vm272_vm0, %v1067_v1 }
  0x1a   : > { %s260_s16 = scalar_lea.vmem %s1298_s0, %s866_s13  ;;  %274 = vst.msk [vmem:[#allocation5] sm:$0xff] (%p266_p13), %vm272_vm0, %v1068_v2  ;;  %276 = vst.msk [vmem:[#allocation7] sm:$0xff] (%p266_p13), %vm272_vm0, %v1068_v2 }
  0x1b   : > { %v1181_v0 = vld [vmem:[%s260_s16] sm:$0xff]  ;;  %278 = vst.msk [vmem:[#allocation2] sm:$0xff] (%p266_p13), %vm277_vm1, %v1068_v2 }
  0x1f PF: > { %p844_p0 = scmp.ne.s32.totalorder %s1049_s21, 0 }
  0x20   : > { %v848_v3 = vcombine.high (!%p844_p0), %v1181_v0, %v1181_v0  ;;  %vm323_vm2 = vcmask (!%p844_p0), 1043456   ;;  %v847_v4 = vcombine.low (!%p844_p0), %v1181_v0, %v1181_v0  ;;  %v1069_v5 = vmov (!%p844_p0), 0   ;;  %v286_v6 = vld [vmem:[%s1300_s2 + $0x8] sm:$0xff] (!%p844_p0)  ;;  %v948_v8 = vld [vmem:[%s1299_s1] sm:$0xff] (!%p844_p0)   ;;  %v287_v10 = vld [vmem:[%s1300_s2 + $0x10] sm:$0xff] (!%p844_p0) }
  0x21   : > { %281 = sbr.rel (%p844_p0) target bundleno = 882 (0x372), region = 48  ;;  %362 = vmatprep.mubr.bf16.mxu0 (!%p844_p0), %v1069_v5  ;;  %946 = vset.pattern.permute.xlu0 (!%p844_p0), %v1069_v5  ;;  %vm316_vm3 = vcmask (!%p844_p0), 64512   ;;  %v949_v9 = vld [vmem:[%s1299_s1 + $0x8] ss:$0 sps:$4 sm:$0xff] (!%p844_p0)   ;;  %v381_v23 = vld [vmem:[#allocation4] sm:$0xff] (!%p844_p0)  ;;  %vm406_vm4 = vcmask (!%p844_p0), 7168  }
  0x22   : > { %849 = vmatprep.subr.msk.bf16.mxu0 (!%p844_p0), %vm323_vm2, %v848_v3  ;;  %v325_v7 = vsel (!%p844_p0), %vm323_vm2, %v847_v4, 0  ;;  %295 = vperm.xlu0 (!%p844_p0), %946, %v286_v6   ;;  %v285_v27 = vld [vmem:[%s1300_s2] sm:$0xff] (!%p844_p0)  ;;  %v400_v53 = vld [vmem:[#allocation5] sm:$0xff] (!%p844_p0) }
  0x23   : > { %331 = vmatpush1.bf16.msra.mxu0 (!%p844_p0), %v325_v7  ;;  %947 = vset.pattern.permute.xlu1 (!%p844_p0), %v1069_v5  ;;  %v462_v47 = vld [vmem:[#allocation6] sm:$0xff] (!%p844_p0) }
  0x24   : > { %300 = vperm.xlu1 (!%p844_p0), %947, %v287_v10  }
  0x26   : > { %850 = vmatmul.mubr.msk.bf16.vlgmr.msra.gmra.mrb[0].mxu0 (!%p844_p0), %vm316_vm3, %v948_v8  ;;  %v481_v8 = vld [vmem:[#allocation7] sm:$0xff] (!%p844_p0) }
  0x27   : > { %372 = vmatprep.mubr.bf16.mxu0 (!%p844_p0), %v1069_v5 }
  0x2e   : > { %851 = vmatmul.mubr.msk.bf16.gmra.mrb[4].mxu0 %vm316_vm3, %v949_v9 }
  0xa1   : > { %v296_v12 = vpop.permute.xlu0 %295 }
  0xa3   : > { %v301_v28 = vpop.permute.xlu1 %300 }
  0xf9   : > { %v364_v11 = vpop.f32.mrb[0].mxu0 }
  0xfa   : > { %v366_v13 = vpop.f32.mrb[1].mxu0 }
  0xfb   : > { %v368_v14 = vpop.f32.mrb[2].mxu0 }
  0xfc   : > { %v369_v15 = vadd.f32 %v368_v14, %v296_v12  ;;  %v370_v16 = vpop.f32.mrb[3].mxu0 }
  0xfd   : > { %v371_v17 = vadd.f32 %v370_v16, %v296_v12  ;;  %v452_v12 = vld [vmem:[#allocation2] sm:$0xff] }
  0xff   : > { %v382_v18 = vmax.f32 %v369_v15, %v371_v17 }
 0x101   : > { %383 = vmax.xlane.f32.xlu0 %v382_v18  ;;  %v374_v19 = vpop.f32.mrb[4].mxu0 }
 0x102   : > { %v376_v20 = vpop.f32.mrb[5].mxu0  ;;  %v375_v29 = vadd.f32 %v374_v19, %v301_v28 }
 0x103   : > { %v378_v21 = vpop.f32.mrb[6].mxu0  ;;  %v377_v30 = vadd.f32 %v376_v20, %v301_v28 }
 0x104   : > { %v379_v22 = vpop.f32.mrb[7].mxu0 }
 0x105   : > { %v463_v31 = vmax.f32 %v375_v29, %v377_v30 }
 0x18e   : > { %v384_v24 = vpop.xlane.xlu0 %383 }
 0x18f   : > { %v385_v25 = vmax.f32 %v381_v23, %v384_v24 }
 0x191   : > { %v386_v26 = vsub.f32 %v381_v23, %v385_v25  ;;  %461 = vst.msk [vmem:[#allocation4] sm:$0xff] %vm406_vm4, %v385_v25  ;;  %391 = vperm.xlu1 %947, %v385_v25  }
 0x193   : > { %v387_v51 = vmul.f32 1.442695, %v386_v26 }
 0x195   : > { %290 = vperm.xlu1 %947, %v285_v27  }
 0x1b9   : > { %464 = vmax.xlane.f32.xlu1 %v463_v31 }
 0x210   : > { %v392_v32 = vpop.permute.xlu1 %391 }
 0x211   : > { %v394_v33 = vsub.f32 %v369_v15, %v392_v32  ;;  %v395_v34 = vsub.f32 %v371_v17, %v392_v32 }
 0x213   : > { %v396_v35 = vmul.f32 1.442695, %v394_v33  ;;  %v398_v36 = vmul.f32 1.442695, %v395_v34 }
 0x214   : > { %v291_v37 = vpop.permute.xlu1 %290 }
 0x215   : > { %950 = vpow2.f32 %v396_v35  ;;  %v365_v38 = vadd.f32 %v364_v11, %v291_v37  ;;  %v367_v39 = vadd.f32 %v366_v13, %v291_v37 }
 0x216   : > { %952 = vpow2.f32 %v398_v36 }
 0x217   : > { %v411_v40 = vpack.c.bf16 %v367_v39, %v367_v39  ;;  %v410_v41 = vpack.c.bf16 %v365_v38, %v365_v38  ;;  %954 = vpow2.f32 %v387_v51 }
 0x219   : > { %412 = vmatprep.subr.bf16.mxu1 %v411_v40 }
 0x21a   : > { %413 = vmatpush1.bf16.xpose.msra.mxu1 %v410_v41 }
 0x21f   : > { %v951_v42 = vpop.eup %950 }
 0x220   : > { %v953_v43 = vpop.eup %952  ;;  %v408_v44 = vpack.c.bf16 %v951_v42, %v951_v42 }
 0x221   : > { %v409_v45 = vpack.c.bf16 %v953_v43, %v953_v43  ;;  %v402_v46 = vadd.f32 %v953_v43, %v951_v42  ;;  %v955_v52 = vpop.eup %954 }
 0x222   : > { %v401_v54 = vmul.f32 %v955_v52, %v400_v53 }
 0x223   : > { %444 = vmatprep.mubr.bf16.mxu1 %v409_v45  ;;  %403 = vadd.xlane.f32.xlu1 %v402_v46 }
 0x224   : > { %445 = vmatmul.mubr.bf16.vlgmr.msra.gmra.mrb[0].mxu1 %v408_v44 }
 0x246   : > { %v465_v48 = vpop.xlane.xlu1 %464 }
 0x247   : > { %v466_v49 = vmax.f32 %v462_v47, %v465_v48 }
 0x249   : > { %v478_v50 = vsub.f32 %v462_v47, %v466_v49  ;;  %488 = vst.msk [vmem:[#allocation6] sm:$0xff] %vm406_vm4, %v466_v49  ;;  %469 = vperm.xlu0 %946, %v466_v49  }
 0x24b   : > { %v479_v6 = vmul.f32 1.442695, %v478_v50 }
 0x2b0   : > { %v404_v55 = vpop.xlane.xlu1 %403 }
 0x2b1   : > { %v405_v56 = vadd.f32 %v404_v55, %v401_v54 }
 0x2b3   : > { %407 = vst.msk [vmem:[#allocation5] sm:$0xff] %vm406_vm4, %v405_v56 }
 0x2c8   : > { %v470_v57 = vpop.permute.xlu0 %469 }
 0x2c9   : > { %v472_v58 = vsub.f32 %v375_v29, %v470_v57  ;;  %v473_v59 = vsub.f32 %v377_v30, %v470_v57 }
 0x2cb   : > { %v474_v60 = vmul.f32 1.442695, %v472_v58  ;;  %v476_v61 = vmul.f32 1.442695, %v473_v59 }
 0x2cd   : > { %956 = vpow2.f32 %v474_v60 }
 0x2ce   : > { %958 = vpow2.f32 %v476_v61 }
 0x2cf   : > { %960 = vpow2.f32 %v479_v6 }
 0x2d7   : > { %v957_v62 = vpop.eup %956 }
 0x2d8   : > { %v959_v63 = vpop.eup %958 }
 0x2d9   : > { %v483_v1 = vadd.f32 %v959_v63, %v957_v62  ;;  %v961_v7 = vpop.eup %960 }
 0x2da   : > { %v482_v9 = vmul.f32 %v961_v7, %v481_v8 }
 0x2db   : > { %484 = vadd.xlane.f32.xlu1 %v483_v1 }
 0x2ec   : > { %455 = vperm.xlu1 %947, %v955_v52  }
 0x2f7   : > { %v446_v2 = vpop.f32.mrb[0].mxu1 }
 0x2f8   : > { %v448_v3 = vpop.f32.mrb[1].mxu1 }
 0x2f9   : > { %v449_v4 = vpop.f32.mrb[2].mxu1 }
 0x2fa   : > { %v450_v5 = vpop.f32.mrb[3].mxu1 }
 0x368   : > { %v485_v10 = vpop.xlane.xlu1 %484 }
 0x369   : > { %v486_v11 = vadd.f32 %v485_v10, %v482_v9 }
 0x36b   : > { %487 = vst.msk [vmem:[#allocation7] sm:$0xff] %vm406_vm4, %v486_v11 }
 0x36c   : > { %v456_v13 = vpop.permute.xlu1 %455 }
 0x36d   : > { %v458_v14 = vmul.f32 %v456_v13, %v452_v12 }
 0x36f   : > { %v459_v15 = vadd.f32 %v458_v14, %v446_v2 }
 0x371   : > { %460 = vst.msk [vmem:[#allocation2] sm:$0xff] %vm316_vm3, %v459_v15 }
 0x372 PF: > { %490 = sbr.rel (!%p266_p13) target bundleno = 1159 (0x487), region = 52  ;;  %v491_v16 = vld [vmem:[#allocation5] sm:$0xff] (%p266_p13)  ;;  %v492_v17 = vld [vmem:[#allocation7] sm:$0xff] (%p266_p13)  ;;  %v1070_v18 = vmov (%p266_p13), 0   ;;  %v495_v20 = vlaneseq (%p266_p13)  ;;  %vm539_vm6 = vcmask (%p266_p13), 60416  }
 0x373   : > { %962 = vset.pattern.permute.xlu0 (%p266_p13), %v1070_v18  ;;  %v493_v19 = vmul.f32 (%p266_p13), %v492_v17, %v491_v16 }
 0x374   : > { %v496_v21 = vshrl.u32 (%p266_p13), %v495_v20, 7 }
 0x375   : > { %963 = vrcp.f32 (%p266_p13), %v493_v19 }
 0x376   : > { %vm497_vm5 = vcmp.lt.s32.totalorder (%p266_p13), %v496_v21, 4 }
 0x378   : > { %v499_v24 = vld [vmem:[#allocation2] sm:$0xff] (%p266_p13) }
 0x37f   : > { %v964_v22 = vpop.eup %963 }
 0x380   : > { %v498_v23 = vsel %vm497_vm5, %v964_v22, 0.0 }
 0x381   : > { %502 = vperm.xlu0 %962, %v498_v23  }
 0x400   : > { %v503_v25 = vpop.permute.xlu0 %502 }
 0x401   : > { %v505_v26 = vmul.f32 %v503_v25, %v499_v24 }
 0x403   : > { %506 = vxpose.xlu0.b32.start.end [1/1] (short) (narrow) %v505_v26, 8 }
 0x483   : > { %v522_v27 = vpop.trf.xlu0 }
 0x484   : > { %v538_v28 = vpack.c.bf16 %v522_v27, %v522_v27 }
 0x486   : > { %540 = vst.msk [vmem:[#allocation3] sm:$0xf] %vm539_vm6, %v538_v28 }
 0x487 PF: > { %p852_p1 = scmp.ne.s32.totalorder %s1049_s21, 1 }
 0x488   : > { %v854_v29 = vcombine.high (!%p852_p1), %v1181_v0, %v1181_v0  ;;  %vm561_vm7 = vcmask (!%p852_p1), 1043456   ;;  %v853_v30 = vcombine.low (!%p852_p1), %v1181_v0, %v1181_v0  ;;  %v546_v31 = vld [vmem:[%s1300_s2 + $0x10] sm:$0xff] (!%p852_p1)  ;;  %v1071_v32 = vmov (!%p852_p1), 0   ;;  %v545_v34 = vld [vmem:[%s1299_s1 + $0x8] sm:$0xf] (!%p852_p1)  ;;  %v609_v35 = vld [vmem:[#allocation6] sm:$0xff] (!%p852_p1) }
 0x489   : > { %544 = sbr.rel (%p852_p1) target bundleno = 1837 (0x72d), region = 56  ;;  %600 = vmatprep.mubr.bf16.mxu0 (!%p852_p1), %v1071_v32  ;;  %965 = vset.pattern.permute.xlu0 (!%p852_p1), %v1071_v32  ;;  %vm557_vm8 = vcmask (!%p852_p1), 64512   ;;  %v677_v53 = vld [vmem:[%s1302_s4] sm:$0xff] (!%p852_p1) }
 0x48a   : > { %855 = vmatprep.subr.msk.bf16.mxu0 (!%p852_p1), %vm561_vm7, %v854_v29  ;;  %v563_v33 = vsel (!%p852_p1), %vm561_vm7, %v853_v30, 0  ;;  %549 = vperm.xlu0 (!%p852_p1), %965, %v546_v31   ;;  %v674_v61 = vld [vmem:[%s1301_s3] sm:$0xf] (!%p852_p1) }
 0x48b   : > { %569 = vmatpush1.bf16.msra.mxu0 (!%p852_p1), %v563_v33  ;;  %665 = vmatprep.mubr.bf16.mxu1 (!%p852_p1), %v1071_v32 }
 0x48c   : > { %966 = vset.pattern.permute.xlu1 (!%p852_p1), %v1071_v32 }
 0x48d   : > { %v623_v52 = vld [vmem:[#allocation3] sm:$0xf] (!%p852_p1)  ;;  %680 = vperm.xlu1 (!%p852_p1), %966, %v677_v53  }
 0x48e   : > { %856 = vmatmul.mubr.msk.bf16.vlgmr.msra.gmra.mrb[0].mxu0 (!%p852_p1), %vm557_vm8, %v545_v34  ;;  %612 = vperm.xlu0 (!%p852_p1), %965, %v609_v35  }
 0x48f   : > { %724 = vmatprep.mubr.bf16.mxu0 (!%p852_p1), %v1071_v32 }
 0x509   : > { %v550_v0 = vpop.permute.xlu0 %549 }
 0x50c   : > { %v681_v62 = vpop.permute.xlu1 %680 }
 0x50d   : > { %v613_v39 = vpop.permute.xlu0 %612 }
 0x561   : > { %v602_v36 = vpop.f32.mrb[0].mxu0 }
 0x562   : > { %v603_v37 = vadd.f32 %v602_v36, %v550_v0  ;;  %v604_v38 = vpop.f32.mrb[1].mxu0 }
 0x563   : > { %v605_v40 = vadd.f32 %v604_v38, %v550_v0  ;;  %v606_v41 = vpop.f32.mrb[2].mxu0 }
 0x564   : > { %v615_v42 = vsub.f32 %v603_v37, %v613_v39  ;;  %v607_v43 = vpop.f32.mrb[3].mxu0 }
 0x565   : > { %v616_v44 = vsub.f32 %v605_v40, %v613_v39 }
 0x566   : > { %v617_v45 = vmul.f32 1.442695, %v615_v42 }
 0x567   : > { %v619_v46 = vmul.f32 1.442695, %v616_v44 }
 0x568   : > { %967 = vpow2.f32 %v617_v45 }
 0x569   : > { %969 = vpow2.f32 %v619_v46 }
 0x572   : > { %v968_v47 = vpop.eup %967 }
 0x573   : > { %v970_v48 = vpop.eup %969  ;;  %v621_v49 = vpack.c.bf16 %v968_v47, %v968_v47 }
 0x574   : > { %v622_v50 = vpack.c.bf16 %v970_v48, %v970_v48 }
 0x575   : > { %v628_v51 = vsel %vm561_vm7, %v621_v49, 0 }
 0x576   : > { %857 = vmatprep.subr.msk.bf16.mxu1 %vm561_vm7, %v622_v50 }
 0x577   : > { %634 = vmatpush1.bf16.msra.mxu1 %v628_v51 }
 0x57a   : > { %858 = vmatmul.mubr.msk.bf16.vlgmr.msra.gmra.mrb[0].mxu1 %vm557_vm8, %v623_v52 }
 0x64d   : > { %v667_v54 = vpop.f32.mrb[0].mxu1 }
 0x64e   : > { %v675_v55 = vpack.c.bf16 %v667_v54, %v667_v54  ;;  %v669_v56 = vpop.f32.mrb[1].mxu1 }
 0x64f   : > { %v676_v57 = vpack.c.bf16 %v669_v56, %v669_v56  ;;  %v671_v58 = vpop.f32.mrb[2].mxu1 }
 0x650   : > { %v687_v59 = vsel %vm561_vm7, %v675_v55, 0  ;;  %v672_v60 = vpop.f32.mrb[3].mxu1 }
 0x651   : > { %859 = vmatprep.subr.msk.bf16.mxu0 %vm561_vm7, %v676_v57 }
 0x652   : > { %693 = vmatpush1.bf16.msra.mxu0 %v687_v59 }
 0x655   : > { %860 = vmatmul.mubr.msk.bf16.vlgmr.msra.gmra.mrb[4].mxu0 %vm557_vm8, %v674_v61 }
 0x728   : > { %v726_v63 = vpop.f32.mrb[4].mxu0 }
 0x729   : > { %v728_v1 = vpop.f32.mrb[5].mxu0  ;;  %v727_v2 = vadd.f32 %v726_v63, %v681_v62 }
 0x72a   : > { %v730_v3 = vpop.f32.mrb[6].mxu0  ;;  %v729_v4 = vadd.f32 %v728_v1, %v681_v62 }
 0x72b   : > { %733 = vst [vmem:[%s1183_s17] sm:$0xff] %v727_v2  ;;  %v731_v5 = vpop.f32.mrb[7].mxu0 }
 0x72c   : > { %734 = vst [vmem:[%s1183_s17 + $0x8] sm:$0xff] %v729_v4 }
 0x72d PF: > { %s868_s14 = sshll.u32 %s1053_s22, 8  ;;  %s753_s27 = sshll.u32 %s1183_s17, 4  ;;  %s754_s27 = int_to_ptr.vmem [resolvable:$true] %s753_s27 }
 0x72e   : > { %s1248_s26 = scalar_lea.hbm %s1303_s5, %s868_s14  ;;  %s736_s21 = scalar_lea.sflag [#allocation9], %s249_s10 }
 0x72f   : > { %s971_s7 = scalar_lea.vmem %s754_s27, 256  ;;  %s1072_s8 = smov [#allocation8]  }
 0x730   : > { %p972_p2 = scmp.ne.s32.totalorder %s754_s27, %s971_s7  ;;  %s975_s11 = sshll.u32 %s1072_s8, 4  ;;  %s976_s11 = int_to_ptr.vmem [resolvable:$false] %s975_s11 }
 0x731   : > { %s977_s12 = scalar_lea.vmem %s976_s11, 512  ;;  %p978_p6 = scmp.lt.s32.totalorder %s754_s27, %s976_s11 }
 0x732   : > { %p973_p4 = pnand %p972_p2, %p1152_p3  ;;  %p979_p7 = scmp.lt.s32.totalorder %s977_s12, %s971_s7 }
 0x734   : > { %p974_p5 = pneg %p973_p4  ;;  %p980_p8 = por %p979_p7, %p978_p6 }
 0x736   : > { %p981_p10 = pnand %p980_p8, %p974_p5 }
 0x738   : > { %984 = shalt.err (!%p981_p10)
}
 0x739   : > { %s985_s22 = scalar_lea.hbm %s1248_s26, 256  ;;  %s989_s13 = scalar_lea.hbm %s1303_s5, 512 }
 0x73a   : > { %p986_p11 = scmp.ne.s32.totalorder %s1248_s26, %s985_s22  ;;  %p990_p0 = scmp.lt.u32.totalorder %s1248_s26, %s1303_s5 }
 0x73b   : > { %p991_p1 = scmp.lt.u32.totalorder %s989_s13, %s985_s22  ;;  %p993_p4 = scmp.lt.u32.totalorder %s985_s22, %s1248_s26 }
 0x73c   : > { %p987_p12 = pnand %p986_p11, %p1152_p3 }
 0x73d   : > { %p992_p2 = por %p991_p1, %p990_p0 }
 0x73e   : > { %p988_p13 = pneg %p987_p12 }
 0x73f   : > { %p994_p5 = por %p993_p4, %p992_p2 }
 0x741   : > { %p995_p6 = pnand %p994_p5, %p988_p13 }
 0x743   : > { %998 = shalt.err (!%p995_p6)
}
 0x744   : > { %869 = dma.vmem_to_hbm [thread:$0]  (%p1152_p3), %s754_s27, 256, %s1248_s26, %s736_s21  }
 0x745 PF: > { %p875_p7 = scmp.ge.s32.totalorder %s1065_s25, 2  ;;  %s765_s16 = sand.u32 1, %s1037_s18  }
 0x746   : > { %s766_s7 = scalar_lea.sflag [#allocation9], %s765_s16 }
 0x747   : > { %p872_p8 = pnand %p875_p7, %p1162_p9 }
 0x749   : > { %1032 = dma.done.wait (!%p872_p8), %s766_s7, 256  }
 0x74a   : > { %1034 = vsyncadd (!%p872_p8), %s766_s7, 4294967040  ;;  %s18_s25 = sadd.s32 1, %s1065_s25   ;;  %s1306_s18 = smov %s1041_s19 }
 0x74b   : > { %p15_p10 = scmp.ge.s32.totalorder %s18_s25, 6   ;;  %s1307_s19 = smov %s1045_s20 }
 0x74c   : > { %s1308_s20 = smov %s1170_s9  ;;  %s1309_s21 = smov %s1057_s23 }
 0x74d   : > { %s1310_s22 = smov %s1061_s24  ;;  %s1311_s23 = smov %s1314_s28 }
 0x74e   : > { %s1312_s24 = smov %s1318_s29  ;;  %17 = sbr.rel (!%p15_p10) target bundleno = 5 (0x5), region = 91 }
 0x755   :  { %771 = vsyncpa [#allocation9], 1 }
 0x756   :  { %773 = vsyncpa [#allocation9 + $0x1], 1 }

// kernel: tpu_custom_call.1
= control target key start
LH: loop header
LB: loop body
LE: loop exit
PB: predicated region body
PF: predicated region fallthrough
CT: control target
= control target key end

     0   :  { %10 = vsyncpa [#allocation9], 0  ;;  %s1298_s0 = inlined_call_operand.vmem [shape: bf16[2,8,256], index: 0, kind: input, shape index: {}]   ;;  %s1299_s1 = inlined_call_operand.vmem [shape: bf16[24,8], index: 1, kind: input, shape index: {}]   ;;  %s1300_s2 = inlined_call_operand.vmem [shape: f32[24,1], index: 2, kind: input, shape index: {}]   ;;  %s1301_s3 = inlined_call_operand.vmem [shape: bf16[8,8], index: 3, kind: input, shape index: {}]   ;;  %s1302_s4 = inlined_call_operand.vmem [shape: f32[8,1], index: 4, kind: input, shape index: {}]   ;;  %s1303_s5 = inlined_call_operand.hbm [shape: f32[2,8,256], index: 5, kind: output, shape index: {}]  }
   0x1   :  { %12 = vsyncpa [#allocation9 + $0x1], 0  ;;  %s1103_s18 = smov 0   ;;  %s1105_s19 = smov 0  }
   0x2   :  { %s1107_s20 = smov 0   ;;  %s1109_s21 = smov 0  }
   0x3   :  { %s1111_s22 = smov 0   ;;  %s1113_s23 = smov 0  }
   0x4   :  { %s1115_s24 = smov 0   ;;  %s1117_s25 = smov 0  }
   0x5 LB: > { %s835_s26 = sadd.s32 4294967295, %s1065_s25   ;;  %s836_s27 = sadd.s32 4294967294, %s1065_s25   ;;  %s1065_s25 = sphi %s1117_s25, %s18_s25   ;;  %s1061_s24 = sphi %s1115_s24, %s1312_s24   ;;  %s1057_s23 = sphi %s1113_s23, %s1311_s23   ;;  %s1053_s22 = sphi %s1111_s22, %s1310_s22   ;;  %s1049_s21 = sphi %s1109_s21, %s1309_s21   ;;  %s1045_s20 = sphi %s1107_s20, %s1308_s20   ;;  %s1041_s19 = sphi %s1105_s19, %s1307_s19   ;;  %s1037_s18 = sphi %s1103_s18, %s1306_s18  }
   0x6   : > { %s33_s28 = sadd.s32 1, %s1057_s23  ;;  %s37_s29 = sadd.s32 1, %s1061_s24 }
   0x7   : > { %p35_p0 = scmp.ge.s32.totalorder %s33_s28, 2  ;;  %p170_p1 = scmp.ne.s32.totalorder %s1045_s20, %s1041_s19 }
   0x8   : > { %p171_p2 = scmp.eq.s32.totalorder %s835_s26, 3  ;;  %p176_p4 = scmp.ne.s32.totalorder %s1041_s19, %s1037_s18 }
   0x9   : > { %s1314_s28 = smov (%p35_p0, %s33_s28), 0  ;;  %s1316_s29 = smov (!%p35_p0, %s37_s29), %s1061_s24 }
   0xa   : > { %p1152_p3 = por %p171_p2, %p170_p1  ;;  %p39_p5 = scmp.ge.s32.totalorder %s1316_s29, 2 }
   0xb   : > { %p177_p6 = scmp.eq.s32.totalorder %s836_s27, 3  ;;  %p839_p7 = scmp.ge.s32.totalorder %s1065_s25, 1 }
   0xc   : > { %p220_p8 = scmp.lt.s32.totalorder %s1065_s25, 5  ;;  %s1318_s29 = smov (%p39_p5, %s1316_s29), 0 }
   0xd   : > { %p1162_p9 = por %p177_p6, %p176_p4  ;;  %s155_s7 = ssub.s32 %s1061_s24, %s1318_s29 }
   0xe   : > { %p221_p10 = pnand %p839_p7, %p220_p8  ;;  %s160_s8 = sadd.s32 1, %s1045_s20 }
   0xf   : > { %p158_p11 = scmp.eq.s32.totalorder %s155_s7, 0  ;;  %s249_s10 = sand.u32 (!%p221_p10), 1, %s1041_s19  }
  0x10   : > { %224 = sbr.rel (%p221_p10) target bundleno = 1861 (0x745), region = 40  ;;  %p253_p12 = scmp.lt.s32.totalorder (!%p221_p10), %s1053_s22, 1 }
  0x11   : > { %s1170_s9 = scalar_select %p158_p11, %s1045_s20, %s160_s8  }
  0x12   : > { %s840_s11 = sshll.u32 (!%p221_p10), %s249_s10, 4  ;;  %p266_p13 = scmp.eq.s32.totalorder (!%p221_p10), %s1049_s21, 0 }
  0x13   : > { %s1183_s17 = scalar_lea.vmem (!%p221_p10), [#allocation8], %s840_s11 }
  0x17   : > { %s254_s12 = scalar_select %p253_p12, %s1053_s22, 1 }
  0x18   : > { %271 = sbr.rel (!%p266_p13) target bundleno = 31 (0x1f), region = 44  ;;  %vm272_vm0 = vcmask (%p266_p13), 7168   ;;  %vm277_vm1 = vcmask (%p266_p13), 64512   ;;  %v1067_v1 = vmov (%p266_p13), -inf   ;;  %v1068_v2 = vmov (%p266_p13), 0.0  }
  0x19   : > { %s866_s13 = sshll.u32 %s254_s12, 3  ;;  %273 = vst.msk [vmem:[#allocation4] sm:$0xff] (%p266_p13), %vm272_vm0, %v1067_v1  ;;  %275 = vst.msk [vmem:[#allocation6] sm:$0xff] (%p266_p13), %vm272_vm0, %v1067_v1 }
  0x1a   : > { %s260_s16 = scalar_lea.vmem %s1298_s0, %s866_s13  ;;  %274 = vst.msk [vmem:[#allocation5] sm:$0xff] (%p266_p13), %vm272_vm0, %v1068_v2  ;;  %276 = vst.msk [vmem:[#allocation7] sm:$0xff] (%p266_p13), %vm272_vm0, %v1068_v2 }
  0x1b   : > { %v1181_v0 = vld [vmem:[%s260_s16] sm:$0xff]  ;;  %278 = vst.msk [vmem:[#allocation2] sm:$0xff] (%p266_p13), %vm277_vm1, %v1068_v2 }
  0x1f PF: > { %p844_p0 = scmp.ne.s32.totalorder %s1049_s21, 0 }
  0x20   : > { %v848_v3 = vcombine.high (!%p844_p0), %v1181_v0, %v1181_v0  ;;  %vm323_vm2 = vcmask (!%p844_p0), 1043456   ;;  %v847_v4 = vcombine.low (!%p844_p0), %v1181_v0, %v1181_v0  ;;  %v1069_v5 = vmov (!%p844_p0), 0   ;;  %v286_v6 = vld [vmem:[%s1300_s2 + $0x8] sm:$0xff] (!%p844_p0)  ;;  %v948_v8 = vld [vmem:[%s1299_s1] sm:$0xff] (!%p844_p0)   ;;  %v287_v10 = vld [vmem:[%s1300_s2 + $0x10] sm:$0xff] (!%p844_p0) }
  0x21   : > { %281 = sbr.rel (%p844_p0) target bundleno = 882 (0x372), region = 48  ;;  %362 = vmatprep.mubr.bf16.mxu0 (!%p844_p0), %v1069_v5  ;;  %946 = vset.pattern.permute.xlu0 (!%p844_p0), %v1069_v5  ;;  %vm316_vm3 = vcmask (!%p844_p0), 64512   ;;  %v949_v9 = vld [vmem:[%s1299_s1 + $0x8] ss:$0 sps:$4 sm:$0xff] (!%p844_p0)   ;;  %v381_v23 = vld [vmem:[#allocation4] sm:$0xff] (!%p844_p0)  ;;  %vm406_vm4 = vcmask (!%p844_p0), 7168  }
  0x22   : > { %849 = vmatprep.subr.msk.bf16.mxu0 (!%p844_p0), %vm323_vm2, %v848_v3  ;;  %v325_v7 = vsel (!%p844_p0), %vm323_vm2, %v847_v4, 0  ;;  %295 = vperm.xlu0 (!%p844_p0), %946, %v286_v6   ;;  %v285_v27 = vld [vmem:[%s1300_s2] sm:$0xff] (!%p844_p0)  ;;  %v400_v53 = vld [vmem:[#allocation5] sm:$0xff] (!%p844_p0) }
  0x23   : > { %331 = vmatpush1.bf16.msra.mxu0 (!%p844_p0), %v325_v7  ;;  %947 = vset.pattern.permute.xlu1 (!%p844_p0), %v1069_v5  ;;  %v462_v47 = vld [vmem:[#allocation6] sm:$0xff] (!%p844_p0) }
  0x24   : > { %300 = vperm.xlu1 (!%p844_p0), %947, %v287_v10  }
  0x26   : > { %850 = vmatmul.mubr.msk.bf16.vlgmr.msra.gmra.mrb[0].mxu0 (!%p844_p0), %vm316_vm3, %v948_v8  ;;  %v481_v8 = vld [vmem:[#allocation7] sm:$0xff] (!%p844_p0) }
  0x27   : > { %372 = vmatprep.mubr.bf16.mxu0 (!%p844_p0), %v1069_v5 }
  0x2e   : > { %851 = vmatmul.mubr.msk.bf16.gmra.mrb[4].mxu0 %vm316_vm3, %v949_v9 }
  0xa1   : > { %v296_v12 = vpop.permute.xlu0 %295 }
  0xa3   : > { %v301_v28 = vpop.permute.xlu1 %300 }
  0xf9   : > { %v364_v11 = vpop.f32.mrb[0].mxu0 }
  0xfa   : > { %v366_v13 = vpop.f32.mrb[1].mxu0 }
  0xfb   : > { %v368_v14 = vpop.f32.mrb[2].mxu0 }
  0xfc   : > { %v369_v15 = vadd.f32 %v368_v14, %v296_v12  ;;  %v370_v16 = vpop.f32.mrb[3].mxu0 }
  0xfd   : > { %v371_v17 = vadd.f32 %v370_v16, %v296_v12  ;;  %v452_v12 = vld [vmem:[#allocation2] sm:$0xff] }
  0xff   : > { %v382_v18 = vmax.f32 %v369_v15, %v371_v17 }
 0x101   : > { %383 = vmax.xlane.f32.xlu0 %v382_v18  ;;  %v374_v19 = vpop.f32.mrb[4].mxu0 }
 0x102   : > { %v376_v20 = vpop.f32.mrb[5].mxu0  ;;  %v375_v29 = vadd.f32 %v374_v19, %v301_v28 }
 0x103   : > { %v378_v21 = vpop.f32.mrb[6].mxu0  ;;  %v377_v30 = vadd.f32 %v376_v20, %v301_v28 }
 0x104   : > { %v379_v22 = vpop.f32.mrb[7].mxu0 }
 0x105   : > { %v463_v31 = vmax.f32 %v375_v29, %v377_v30 }
 0x18e   : > { %v384_v24 = vpop.xlane.xlu0 %383 }
 0x18f   : > { %v385_v25 = vmax.f32 %v381_v23, %v384_v24 }
 0x191   : > { %v386_v26 = vsub.f32 %v381_v23, %v385_v25  ;;  %461 = vst.msk [vmem:[#allocation4] sm:$0xff] %vm406_vm4, %v385_v25  ;;  %391 = vperm.xlu1 %947, %v385_v25  }
 0x193   : > { %v387_v51 = vmul.f32 1.442695, %v386_v26 }
 0x195   : > { %290 = vperm.xlu1 %947, %v285_v27  }
 0x1b9   : > { %464 = vmax.xlane.f32.xlu1 %v463_v31 }
 0x210   : > { %v392_v32 = vpop.permute.xlu1 %391 }
 0x211   : > { %v394_v33 = vsub.f32 %v369_v15, %v392_v32  ;;  %v395_v34 = vsub.f32 %v371_v17, %v392_v32 }
 0x213   : > { %v396_v35 = vmul.f32 1.442695, %v394_v33  ;;  %v398_v36 = vmul.f32 1.442695, %v395_v34 }
 0x214   : > { %v291_v37 = vpop.permute.xlu1 %290 }
 0x215   : > { %950 = vpow2.f32 %v396_v35  ;;  %v365_v38 = vadd.f32 %v364_v11, %v291_v37  ;;  %v367_v39 = vadd.f32 %v366_v13, %v291_v37 }
 0x216   : > { %952 = vpow2.f32 %v398_v36 }
 0x217   : > { %v411_v40 = vpack.c.bf16 %v367_v39, %v367_v39  ;;  %v410_v41 = vpack.c.bf16 %v365_v38, %v365_v38  ;;  %954 = vpow2.f32 %v387_v51 }
 0x219   : > { %412 = vmatprep.subr.bf16.mxu1 %v411_v40 }
 0x21a   : > { %413 = vmatpush1.bf16.xpose.msra.mxu1 %v410_v41 }
 0x21f   : > { %v951_v42 = vpop.eup %950 }
 0x220   : > { %v953_v43 = vpop.eup %952  ;;  %v408_v44 = vpack.c.bf16 %v951_v42, %v951_v42 }
 0x221   : > { %v409_v45 = vpack.c.bf16 %v953_v43, %v953_v43  ;;  %v402_v46 = vadd.f32 %v953_v43, %v951_v42  ;;  %v955_v52 = vpop.eup %954 }
 0x222   : > { %v401_v54 = vmul.f32 %v955_v52, %v400_v53 }
 0x223   : > { %444 = vmatprep.mubr.bf16.mxu1 %v409_v45  ;;  %403 = vadd.xlane.f32.xlu1 %v402_v46 }
 0x224   : > { %445 = vmatmul.mubr.bf16.vlgmr.msra.gmra.mrb[0].mxu1 %v408_v44 }
 0x246   : > { %v465_v48 = vpop.xlane.xlu1 %464 }
 0x247   : > { %v466_v49 = vmax.f32 %v462_v47, %v465_v48 }
 0x249   : > { %v478_v50 = vsub.f32 %v462_v47, %v466_v49  ;;  %488 = vst.msk [vmem:[#allocation6] sm:$0xff] %vm406_vm4, %v466_v49  ;;  %469 = vperm.xlu0 %946, %v466_v49  }
 0x24b   : > { %v479_v6 = vmul.f32 1.442695, %v478_v50 }
 0x2b0   : > { %v404_v55 = vpop.xlane.xlu1 %403 }
 0x2b1   : > { %v405_v56 = vadd.f32 %v404_v55, %v401_v54 }
 0x2b3   : > { %407 = vst.msk [vmem:[#allocation5] sm:$0xff] %vm406_vm4, %v405_v56 }
 0x2c8   : > { %v470_v57 = vpop.permute.xlu0 %469 }
 0x2c9   : > { %v472_v58 = vsub.f32 %v375_v29, %v470_v57  ;;  %v473_v59 = vsub.f32 %v377_v30, %v470_v57 }
 0x2cb   : > { %v474_v60 = vmul.f32 1.442695, %v472_v58  ;;  %v476_v61 = vmul.f32 1.442695, %v473_v59 }
 0x2cd   : > { %956 = vpow2.f32 %v474_v60 }
 0x2ce   : > { %958 = vpow2.f32 %v476_v61 }
 0x2cf   : > { %960 = vpow2.f32 %v479_v6 }
 0x2d7   : > { %v957_v62 = vpop.eup %956 }
 0x2d8   : > { %v959_v63 = vpop.eup %958 }
 0x2d9   : > { %v483_v1 = vadd.f32 %v959_v63, %v957_v62  ;;  %v961_v7 = vpop.eup %960 }
 0x2da   : > { %v482_v9 = vmul.f32 %v961_v7, %v481_v8 }
 0x2db   : > { %484 = vadd.xlane.f32.xlu1 %v483_v1 }
 0x2ec   : > { %455 = vperm.xlu1 %947, %v955_v52  }
 0x2f7   : > { %v446_v2 = vpop.f32.mrb[0].mxu1 }
 0x2f8   : > { %v448_v3 = vpop.f32.mrb[1].mxu1 }
 0x2f9   : > { %v449_v4 = vpop.f32.mrb[2].mxu1 }
 0x2fa   : > { %v450_v5 = vpop.f32.mrb[3].mxu1 }
 0x368   : > { %v485_v10 = vpop.xlane.xlu1 %484 }
 0x369   : > { %v486_v11 = vadd.f32 %v485_v10, %v482_v9 }
 0x36b   : > { %487 = vst.msk [vmem:[#allocation7] sm:$0xff] %vm406_vm4, %v486_v11 }
 0x36c   : > { %v456_v13 = vpop.permute.xlu1 %455 }
 0x36d   : > { %v458_v14 = vmul.f32 %v456_v13, %v452_v12 }
 0x36f   : > { %v459_v15 = vadd.f32 %v458_v14, %v446_v2 }
 0x371   : > { %460 = vst.msk [vmem:[#allocation2] sm:$0xff] %vm316_vm3, %v459_v15 }
 0x372 PF: > { %490 = sbr.rel (!%p266_p13) target bundleno = 1159 (0x487), region = 52  ;;  %v491_v16 = vld [vmem:[#allocation5] sm:$0xff] (%p266_p13)  ;;  %v492_v17 = vld [vmem:[#allocation7] sm:$0xff] (%p266_p13)  ;;  %v1070_v18 = vmov (%p266_p13), 0   ;;  %v495_v20 = vlaneseq (%p266_p13)  ;;  %vm539_vm6 = vcmask (%p266_p13), 60416  }
 0x373   : > { %962 = vset.pattern.permute.xlu0 (%p266_p13), %v1070_v18  ;;  %v493_v19 = vmul.f32 (%p266_p13), %v492_v17, %v491_v16 }
 0x374   : > { %v496_v21 = vshrl.u32 (%p266_p13), %v495_v20, 7 }
 0x375   : > { %963 = vrcp.f32 (%p266_p13), %v493_v19 }
 0x376   : > { %vm497_vm5 = vcmp.lt.s32.totalorder (%p266_p13), %v496_v21, 4 }
 0x378   : > { %v499_v24 = vld [vmem:[#allocation2] sm:$0xff] (%p266_p13) }
 0x37f   : > { %v964_v22 = vpop.eup %963 }
 0x380   : > { %v498_v23 = vsel %vm497_vm5, %v964_v22, 0.0 }
 0x381   : > { %502 = vperm.xlu0 %962, %v498_v23  }
 0x400   : > { %v503_v25 = vpop.permute.xlu0 %502 }
 0x401   : > { %v505_v26 = vmul.f32 %v503_v25, %v499_v24 }
 0x403   : > { %506 = vxpose.xlu0.b32.start.end [1/1] (short) (narrow) %v505_v26, 8 }
 0x483   : > { %v522_v27 = vpop.trf.xlu0 }
 0x484   : > { %v538_v28 = vpack.c.bf16 %v522_v27, %v522_v27 }
 0x486   : > { %540 = vst.msk [vmem:[#allocation3] sm:$0xf] %vm539_vm6, %v538_v28 }
 0x487 PF: > { %p852_p1 = scmp.ne.s32.totalorder %s1049_s21, 1 }
 0x488   : > { %v854_v29 = vcombine.high (!%p852_p1), %v1181_v0, %v1181_v0  ;;  %vm561_vm7 = vcmask (!%p852_p1), 1043456   ;;  %v853_v30 = vcombine.low (!%p852_p1), %v1181_v0, %v1181_v0  ;;  %v546_v31 = vld [vmem:[%s1300_s2 + $0x10] sm:$0xff] (!%p852_p1)  ;;  %v1071_v32 = vmov (!%p852_p1), 0   ;;  %v545_v34 = vld [vmem:[%s1299_s1 + $0x8] sm:$0xf] (!%p852_p1)  ;;  %v609_v35 = vld [vmem:[#allocation6] sm:$0xff] (!%p852_p1) }
 0x489   : > { %544 = sbr.rel (%p852_p1) target bundleno = 1837 (0x72d), region = 56  ;;  %600 = vmatprep.mubr.bf16.mxu0 (!%p852_p1), %v1071_v32  ;;  %965 = vset.pattern.permute.xlu0 (!%p852_p1), %v1071_v32  ;;  %vm557_vm8 = vcmask (!%p852_p1), 64512   ;;  %v677_v53 = vld [vmem:[%s1302_s4] sm:$0xff] (!%p852_p1) }
 0x48a   : > { %855 = vmatprep.subr.msk.bf16.mxu0 (!%p852_p1), %vm561_vm7, %v854_v29  ;;  %v563_v33 = vsel (!%p852_p1), %vm561_vm7, %v853_v30, 0  ;;  %549 = vperm.xlu0 (!%p852_p1), %965, %v546_v31   ;;  %v674_v61 = vld [vmem:[%s1301_s3] sm:$0xf] (!%p852_p1) }
 0x48b   : > { %569 = vmatpush1.bf16.msra.mxu0 (!%p852_p1), %v563_v33  ;;  %665 = vmatprep.mubr.bf16.mxu1 (!%p852_p1), %v1071_v32 }
 0x48c   : > { %966 = vset.pattern.permute.xlu1 (!%p852_p1), %v1071_v32 }
 0x48d   : > { %v623_v52 = vld [vmem:[#allocation3] sm:$0xf] (!%p852_p1)  ;;  %680 = vperm.xlu1 (!%p852_p1), %966, %v677_v53  }
 0x48e   : > { %856 = vmatmul.mubr.msk.bf16.vlgmr.msra.gmra.mrb[0].mxu0 (!%p852_p1), %vm557_vm8, %v545_v34  ;;  %612 = vperm.xlu0 (!%p852_p1), %965, %v609_v35  }
 0x48f   : > { %724 = vmatprep.mubr.bf16.mxu0 (!%p852_p1), %v1071_v32 }
 0x509   : > { %v550_v0 = vpop.permute.xlu0 %549 }
 0x50c   : > { %v681_v62 = vpop.permute.xlu1 %680 }
 0x50d   : > { %v613_v39 = vpop.permute.xlu0 %612 }
 0x561   : > { %v602_v36 = vpop.f32.mrb[0].mxu0 }
 0x562   : > { %v603_v37 = vadd.f32 %v602_v36, %v550_v0  ;;  %v604_v38 = vpop.f32.mrb[1].mxu0 }
 0x563   : > { %v605_v40 = vadd.f32 %v604_v38, %v550_v0  ;;  %v606_v41 = vpop.f32.mrb[2].mxu0 }
 0x564   : > { %v615_v42 = vsub.f32 %v603_v37, %v613_v39  ;;  %v607_v43 = vpop.f32.mrb[3].mxu0 }
 0x565   : > { %v616_v44 = vsub.f32 %v605_v40, %v613_v39 }
 0x566   : > { %v617_v45 = vmul.f32 1.442695, %v615_v42 }
 0x567   : > { %v619_v46 = vmul.f32 1.442695, %v616_v44 }
 0x568   : > { %967 = vpow2.f32 %v617_v45 }
 0x569   : > { %969 = vpow2.f32 %v619_v46 }
 0x572   : > { %v968_v47 = vpop.eup %967 }
 0x573   : > { %v970_v48 = vpop.eup %969  ;;  %v621_v49 = vpack.c.bf16 %v968_v47, %v968_v47 }
 0x574   : > { %v622_v50 = vpack.c.bf16 %v970_v48, %v970_v48 }
 0x575   : > { %v628_v51 = vsel %vm561_vm7, %v621_v49, 0 }
 0x576   : > { %857 = vmatprep.subr.msk.bf16.mxu1 %vm561_vm7, %v622_v50 }
 0x577   : > { %634 = vmatpush1.bf16.msra.mxu1 %v628_v51 }
 0x57a   : > { %858 = vmatmul.mubr.msk.bf16.vlgmr.msra.gmra.mrb[0].mxu1 %vm557_vm8, %v623_v52 }
 0x64d   : > { %v667_v54 = vpop.f32.mrb[0].mxu1 }
 0x64e   : > { %v675_v55 = vpack.c.bf16 %v667_v54, %v667_v54  ;;  %v669_v56 = vpop.f32.mrb[1].mxu1 }
 0x64f   : > { %v676_v57 = vpack.c.bf16 %v669_v56, %v669_v56  ;;  %v671_v58 = vpop.f32.mrb[2].mxu1 }
 0x650   : > { %v687_v59 = vsel %vm561_vm7, %v675_v55, 0  ;;  %v672_v60 = vpop.f32.mrb[3].mxu1 }
 0x651   : > { %859 = vmatprep.subr.msk.bf16.mxu0 %vm561_vm7, %v676_v57 }
 0x652   : > { %693 = vmatpush1.bf16.msra.mxu0 %v687_v59 }
 0x655   : > { %860 = vmatmul.mubr.msk.bf16.vlgmr.msra.gmra.mrb[4].mxu0 %vm557_vm8, %v674_v61 }
 0x728   : > { %v726_v63 = vpop.f32.mrb[4].mxu0 }
 0x729   : > { %v728_v1 = vpop.f32.mrb[5].mxu0  ;;  %v727_v2 = vadd.f32 %v726_v63, %v681_v62 }
 0x72a   : > { %v730_v3 = vpop.f32.mrb[6].mxu0  ;;  %v729_v4 = vadd.f32 %v728_v1, %v681_v62 }
 0x72b   : > { %733 = vst [vmem:[%s1183_s17] sm:$0xff] %v727_v2  ;;  %v731_v5 = vpop.f32.mrb[7].mxu0 }
 0x72c   : > { %734 = vst [vmem:[%s1183_s17 + $0x8] sm:$0xff] %v729_v4 }
 0x72d PF: > { %s868_s14 = sshll.u32 %s1053_s22, 8  ;;  %s753_s27 = sshll.u32 %s1183_s17, 4  ;;  %s754_s27 = int_to_ptr.vmem [resolvable:$true] %s753_s27 }
 0x72e   : > { %s1248_s26 = scalar_lea.hbm %s1303_s5, %s868_s14  ;;  %s736_s21 = scalar_lea.sflag [#allocation9], %s249_s10 }
 0x72f   : > { %s971_s7 = scalar_lea.vmem %s754_s27, 256  ;;  %s1072_s8 = smov [#allocation8]  }
 0x730   : > { %p972_p2 = scmp.ne.s32.totalorder %s754_s27, %s971_s7  ;;  %s975_s11 = sshll.u32 %s1072_s8, 4  ;;  %s976_s11 = int_to_ptr.vmem [resolvable:$false] %s975_s11 }
 0x731   : > { %s977_s12 = scalar_lea.vmem %s976_s11, 512  ;;  %p978_p6 = scmp.lt.s32.totalorder %s754_s27, %s976_s11 }
 0x732   : > { %p973_p4 = pnand %p972_p2, %p1152_p3  ;;  %p979_p7 = scmp.lt.s32.totalorder %s977_s12, %s971_s7 }
 0x734   : > { %p974_p5 = pneg %p973_p4  ;;  %p980_p8 = por %p979_p7, %p978_p6 }
 0x736   : > { %p981_p10 = pnand %p980_p8, %p974_p5 }
 0x738   : > { %984 = shalt.err (!%p981_p10)
}
 0x739   : > { %s985_s22 = scalar_lea.hbm %s1248_s26, 256  ;;  %s989_s13 = scalar_lea.hbm %s1303_s5, 512 }
 0x73a   : > { %p986_p11 = scmp.ne.s32.totalorder %s1248_s26, %s985_s22  ;;  %p990_p0 = scmp.lt.u32.totalorder %s1248_s26, %s1303_s5 }
 0x73b   : > { %p991_p1 = scmp.lt.u32.totalorder %s989_s13, %s985_s22  ;;  %p993_p4 = scmp.lt.u32.totalorder %s985_s22, %s1248_s26 }
 0x73c   : > { %p987_p12 = pnand %p986_p11, %p1152_p3 }
 0x73d   : > { %p992_p2 = por %p991_p1, %p990_p0 }
 0x73e   : > { %p988_p13 = pneg %p987_p12 }
 0x73f   : > { %p994_p5 = por %p993_p4, %p992_p2 }
 0x741   : > { %p995_p6 = pnand %p994_p5, %p988_p13 }
 0x743   : > { %998 = shalt.err (!%p995_p6)
}
 0x744   : > { %869 = dma.vmem_to_hbm [thread:$0]  (%p1152_p3), %s754_s27, 256, %s1248_s26, %s736_s21  }
 0x745 PF: > { %p875_p7 = scmp.ge.s32.totalorder %s1065_s25, 2  ;;  %s765_s16 = sand.u32 1, %s1037_s18  }
 0x746   : > { %s766_s7 = scalar_lea.sflag [#allocation9], %s765_s16 }
 0x747   : > { %p872_p8 = pnand %p875_p7, %p1162_p9 }
 0x749   : > { %1032 = dma.done.wait (!%p872_p8), %s766_s7, 256  }
 0x74a   : > { %1034 = vsyncadd (!%p872_p8), %s766_s7, 4294967040  ;;  %s18_s25 = sadd.s32 1, %s1065_s25   ;;  %s1306_s18 = smov %s1041_s19 }
 0x74b   : > { %p15_p10 = scmp.ge.s32.totalorder %s18_s25, 6   ;;  %s1307_s19 = smov %s1045_s20 }
 0x74c   : > { %s1308_s20 = smov %s1170_s9  ;;  %s1309_s21 = smov %s1057_s23 }
 0x74d   : > { %s1310_s22 = smov %s1061_s24  ;;  %s1311_s23 = smov %s1314_s28 }
 0x74e   : > { %s1312_s24 = smov %s1318_s29  ;;  %17 = sbr.rel (!%p15_p10) target bundleno = 5 (0x5), region = 91 }
 0x755   :  { %771 = vsyncpa [#allocation9], 1 }
 0x756   :  { %773 = vsyncpa [#allocation9 + $0x1], 1 }

</bundles_post_ra>
